<compile_context>
chip_gen: v7x
topology: tpu7x:2x2x1
jax: 0.10.0
libtpu: 0.0.40
codegen_flags: <defaults>
</compile_context>

<pallas_src>
import functools

import jax
import jax.numpy as jnp
from jax.experimental import pallas as pl
from jax.experimental.pallas import tpu as pltpu

HIDDEN_SIZES = (128, 256, 512, 256, 128)
LN_EPS = 1e-5


def fc_q_kernel(x_ref, *refs):
    """Fused forward pass for one batch tile.

    refs = [w0, b0, g0, be0, ..., w4, b4, g4, be4, w_out, b_out, out_ref]
      w*    : bf16 [in, out]   (pre-transposed Linear weight)
      b*    : f32  [1, out]    Linear bias
      g*/be*: f32  [1, out]    LayerNorm gamma / beta
      w_out : bf16 [in, n_pad] (lane-padded head weight)
      b_out : f32  [1, n_pad]
    """
    out_ref = refs[-1]
    params = refs[:-1]

    q = x_ref[...]                               # bf16 (cast in the wrapper)

    idx = 0
    for _ in HIDDEN_SIZES:
        w_ref, b_ref, g_ref, be_ref = params[idx:idx + 4]
        idx += 4

        # Linear: bf16 x bf16 -> f32 accumulate on the MXU.
        h = jnp.dot(q, w_ref[...], preferred_element_type=jnp.float32) + b_ref[...]

        # LayerNorm over the feature (lane) axis, biased variance like torch.
        # var = E[h^2] - mu^2: both XLU reductions issue from h in one pass
        # (no mu -> centered-h serial dependency); clamp for cancellation.
        mu = jnp.mean(h, axis=-1, keepdims=True)
        msq = jnp.mean(h * h, axis=-1, keepdims=True)
        var = jnp.maximum(msq - mu * mu, 0.0)
        h = (h - mu) * jax.lax.rsqrt(var + LN_EPS) * g_ref[...] + be_ref[...]

        # ReLU, back to bf16 for the next matmul.
        q = jnp.maximum(h, 0.0).astype(jnp.bfloat16)

    w_out, b_out = params[idx], params[idx + 1]
    out_ref[...] = (
        jnp.dot(q, w_out[...], preferred_element_type=jnp.float32) + b_out[...]
    ).astype(out_ref.dtype)


def make_params(key, state_dim, num_actions, hidden_sizes=HIDDEN_SIZES):
    """Raw f32 parameters, PyTorch Linear / LayerNorm style init."""
    params = []
    in_size = state_dim
    for h in hidden_sizes:
        key, kw, kb = jax.random.split(key, 3)
        bound = 1.0 / jnp.sqrt(in_size)
        w = jax.random.uniform(kw, (in_size, h), jnp.float32, -bound, bound)
        b = jax.random.uniform(kb, (1, h), jnp.float32, -bound, bound)
        gamma = jnp.ones((1, h), jnp.float32)    # LayerNorm weight init
        beta = jnp.zeros((1, h), jnp.float32)    # LayerNorm bias init
        params += [w, b, gamma, beta]
        in_size = h
    key, kw, kb = jax.random.split(key, 3)
    bound = 1.0 / jnp.sqrt(in_size)
    w_out = jax.random.uniform(kw, (in_size, num_actions), jnp.float32, -bound, bound)
    b_out = jax.random.uniform(kb, (1, num_actions), jnp.float32, -bound, bound)
    params += [w_out, b_out]
    return params


def pack_params(params, hidden_sizes=HIDDEN_SIZES):
    """bf16 weights; f32 (1, h) bias/gamma/beta; lane-padded (>=128) head."""
    packed = []
    idx = 0
    for _ in hidden_sizes:
        w, b, gamma, beta = params[idx], params[idx + 1], params[idx + 2], params[idx + 3]
        idx += 4
        packed += [w.astype(jnp.bfloat16), b, gamma, beta]
    w_out, b_out = params[idx], params[idx + 1]
    n = w_out.shape[-1]
    n_pad = int(pl.cdiv(n, 128)) * 128
    w_out_p = jnp.zeros((w_out.shape[0], n_pad), jnp.bfloat16)
    w_out_p = w_out_p.at[:, :n].set(w_out.astype(jnp.bfloat16))
    b_out_p = jnp.zeros((1, n_pad), jnp.float32).at[:, :n].set(b_out)
    packed += [w_out_p, b_out_p]
    return packed


def _round_up(x, m):
    return ((x + m - 1) // m) * m


def _pick_batch_tile(B):
    MAX_TILE = 1024  # f32 intermediates ~2 MiB each; fits every chip at 32 MiB scoped.
    if B <= MAX_TILE:
        return max(_round_up(B, 16), 16)      # single grid step, bf16-sublane aligned
    # Large B: prefer the largest tile giving an EVEN step count (balances
    # v7x's two TensorCores) without padding waste; otherwise take MAX_TILE.
    for tile in (1024, 512):
        if int(pl.cdiv(B, tile)) % 2 == 0:
            return tile
    return MAX_TILE


@functools.partial(jax.jit, static_argnames=("num_actions", "batch_tile"))
def fc_q_forward(state, packed_params, num_actions, batch_tile=None):
    B, state_dim = state.shape
    n_pad = packed_params[-1].shape[-1]

    if batch_tile is None:
        batch_tile = _pick_batch_tile(B)
    batch_tile = max(_round_up(int(batch_tile), 16), 16)

    # Pad the batch up to a multiple of the tile (zero rows are harmless:
    # LN(b) is finite thanks to +eps) and cast to bf16 for the MXU here so
    # the per-tile input DMA is half-width and the kernel does no input cast.
    B_pad = _round_up(B, batch_tile)
    x = state
    if B_pad != B:
        x = jnp.pad(x, ((0, B_pad - B), (0, 0)))
    x = x.astype(jnp.bfloat16)

    grid = (B_pad // batch_tile,)

    # x is tiled over batch; parameters are small, index-invariant and live
    # whole in VMEM (block index always (0, 0)).
    in_specs = [pl.BlockSpec((batch_tile, state_dim), lambda i: (i, 0))]
    for p in packed_params:
        in_specs.append(pl.BlockSpec(p.shape, lambda i: (0, 0)))

    out_padded = pl.pallas_call(
        fc_q_kernel,
        out_shape=jax.ShapeDtypeStruct((B_pad, n_pad), jnp.float32),
        grid=grid,
        in_specs=in_specs,
        out_specs=pl.BlockSpec((batch_tile, n_pad), lambda i: (i, 0)),
        compiler_params=pltpu.CompilerParams(
            dimension_semantics=("parallel",),
            vmem_limit_bytes=32 * 1024 * 1024,   # raise v5e's 16 MiB default
        ),
    )(x, *packed_params)
    return out_padded[:B, :num_actions]


def fc_q_reference(state, packed_params, num_actions):
    """Pure-JAX reference mirroring the kernel's numerics (bf16 matmuls)."""
    q = state.astype(jnp.bfloat16)
    idx = 0
    for _ in HIDDEN_SIZES:
        w, b, gamma, beta = packed_params[idx:idx + 4]
        idx += 4
        h = jnp.dot(q, w, preferred_element_type=jnp.float32) + b
        mu = jnp.mean(h, axis=-1, keepdims=True)
        msq = jnp.mean(h * h, axis=-1, keepdims=True)
        var = jnp.maximum(msq - mu * mu, 0.0)
        h = (h - mu) * jax.lax.rsqrt(var + LN_EPS) * gamma + beta
        q = jnp.maximum(h, 0.0).astype(jnp.bfloat16)
    w_out, b_out = packed_params[idx], packed_params[idx + 1]
    full = jnp.dot(q, w_out, preferred_element_type=jnp.float32) + b_out
    return full[:, :num_actions]


if __name__ == "__main__":
    key = jax.random.PRNGKey(0)
    k_state, k_params = jax.random.split(key)

    batch, state_dim, num_actions = 16, 8, 4
    state = jax.random.normal(k_state, (batch, state_dim), jnp.float32)

    raw_params = make_params(k_params, state_dim, num_actions)
    packed = pack_params(raw_params)

    out = fc_q_forward(state, packed, num_actions)
    out = jax.block_until_ready(out)

    ref = fc_q_reference(state, packed, num_actions)
    assert out.shape == (batch, num_actions)
    assert jnp.allclose(out, ref, atol=1e-2, rtol=1e-2), float(
        jnp.max(jnp.abs(out - ref))
    )

    print("KERNEL_OK")
</pallas_src>

<mosaic_0001>
module attributes {stable_mosaic.version = 11 : i64} {
  func.func @fc_q_kernel(%arg0: i32, %arg1: memref<16x8xbf16, #tpu.memory_space<vmem>>, %arg2: memref<8x128xbf16, #tpu.memory_space<vmem>>, %arg3: memref<1x128xf32, #tpu.memory_space<vmem>>, %arg4: memref<1x128xf32, #tpu.memory_space<vmem>>, %arg5: memref<1x128xf32, #tpu.memory_space<vmem>>, %arg6: memref<128x256xbf16, #tpu.memory_space<vmem>>, %arg7: memref<1x256xf32, #tpu.memory_space<vmem>>, %arg8: memref<1x256xf32, #tpu.memory_space<vmem>>, %arg9: memref<1x256xf32, #tpu.memory_space<vmem>>, %arg10: memref<256x512xbf16, #tpu.memory_space<vmem>>, %arg11: memref<1x512xf32, #tpu.memory_space<vmem>>, %arg12: memref<1x512xf32, #tpu.memory_space<vmem>>, %arg13: memref<1x512xf32, #tpu.memory_space<vmem>>, %arg14: memref<512x256xbf16, #tpu.memory_space<vmem>>, %arg15: memref<1x256xf32, #tpu.memory_space<vmem>>, %arg16: memref<1x256xf32, #tpu.memory_space<vmem>>, %arg17: memref<1x256xf32, #tpu.memory_space<vmem>>, %arg18: memref<256x128xbf16, #tpu.memory_space<vmem>>, %arg19: memref<1x128xf32, #tpu.memory_space<vmem>>, %arg20: memref<1x128xf32, #tpu.memory_space<vmem>>, %arg21: memref<1x128xf32, #tpu.memory_space<vmem>>, %arg22: memref<128x128xbf16, #tpu.memory_space<vmem>>, %arg23: memref<1x128xf32, #tpu.memory_space<vmem>>, %arg24: memref<16x128xf32, #tpu.memory_space<vmem>>) attributes {dimension_semantics = [#tpu.dimension_semantics<parallel>], iteration_bounds = array<i64: 1>, scalar_prefetch = 0 : i64, scratch_operands = 0 : i64, tpu.core_type = #tpu.core_type<tc>, window_params = [{transform_indices = @transform_0, window_bounds = array<i64: 16, 8>}, {pipeline_mode = #tpu.pipeline_mode<synchronous>, transform_indices = @transform_1, window_bounds = array<i64: 8, 128>}, {pipeline_mode = #tpu.pipeline_mode<synchronous>, transform_indices = @transform_2, window_bounds = array<i64: 1, 128>}, {pipeline_mode = #tpu.pipeline_mode<synchronous>, transform_indices = @transform_3, window_bounds = array<i64: 1, 128>}, {pipeline_mode = #tpu.pipeline_mode<synchronous>, transform_indices = @transform_4, window_bounds = array<i64: 1, 128>}, {pipeline_mode = #tpu.pipeline_mode<synchronous>, transform_indices = @transform_5, window_bounds = array<i64: 128, 256>}, {pipeline_mode = #tpu.pipeline_mode<synchronous>, transform_indices = @transform_6, window_bounds = array<i64: 1, 256>}, {pipeline_mode = #tpu.pipeline_mode<synchronous>, transform_indices = @transform_7, window_bounds = array<i64: 1, 256>}, {pipeline_mode = #tpu.pipeline_mode<synchronous>, transform_indices = @transform_8, window_bounds = array<i64: 1, 256>}, {pipeline_mode = #tpu.pipeline_mode<synchronous>, transform_indices = @transform_9, window_bounds = array<i64: 256, 512>}, {pipeline_mode = #tpu.pipeline_mode<synchronous>, transform_indices = @transform_10, window_bounds = array<i64: 1, 512>}, {pipeline_mode = #tpu.pipeline_mode<synchronous>, transform_indices = @transform_11, window_bounds = array<i64: 1, 512>}, {pipeline_mode = #tpu.pipeline_mode<synchronous>, transform_indices = @transform_12, window_bounds = array<i64: 1, 512>}, {pipeline_mode = #tpu.pipeline_mode<synchronous>, transform_indices = @transform_13, window_bounds = array<i64: 512, 256>}, {pipeline_mode = #tpu.pipeline_mode<synchronous>, transform_indices = @transform_14, window_bounds = array<i64: 1, 256>}, {pipeline_mode = #tpu.pipeline_mode<synchronous>, transform_indices = @transform_15, window_bounds = array<i64: 1, 256>}, {pipeline_mode = #tpu.pipeline_mode<synchronous>, transform_indices = @transform_16, window_bounds = array<i64: 1, 256>}, {pipeline_mode = #tpu.pipeline_mode<synchronous>, transform_indices = @transform_17, window_bounds = array<i64: 256, 128>}, {pipeline_mode = #tpu.pipeline_mode<synchronous>, transform_indices = @transform_18, window_bounds = array<i64: 1, 128>}, {pipeline_mode = #tpu.pipeline_mode<synchronous>, transform_indices = @transform_19, window_bounds = array<i64: 1, 128>}, {pipeline_mode = #tpu.pipeline_mode<synchronous>, transform_indices = @transform_20, window_bounds = array<i64: 1, 128>}, {pipeline_mode = #tpu.pipeline_mode<synchronous>, transform_indices = @transform_21, window_bounds = array<i64: 128, 128>}, {pipeline_mode = #tpu.pipeline_mode<synchronous>, transform_indices = @transform_22, window_bounds = array<i64: 1, 128>}, {transform_indices = @transform_23, window_bounds = array<i64: 16, 128>}]} {
    %c0 = arith.constant 0 : index
    %c0_0 = arith.constant 0 : index
    %0 = vector.load %arg1[%c0, %c0_0] : memref<16x8xbf16, #tpu.memory_space<vmem>>, vector<16x8xbf16>
    %c0_1 = arith.constant 0 : index
    %c0_2 = arith.constant 0 : index
    %1 = vector.load %arg2[%c0_1, %c0_2] : memref<8x128xbf16, #tpu.memory_space<vmem>>, vector<8x128xbf16>
    %cst = arith.constant dense<0.000000e+00> : vector<16x128xf32>
    %2 = tpu.matmul %0, %1, %cst {dimension_numbers = #tpu.dot_dimension_numbers<[1], [0], [0], [1], [0, 0, 1, 1], [], []>} : vector<16x8xbf16>, vector<8x128xbf16>, vector<16x128xf32> -> vector<16x128xf32>
    %c0_3 = arith.constant 0 : index
    %c0_4 = arith.constant 0 : index
    %3 = vector.load %arg3[%c0_3, %c0_4] : memref<1x128xf32, #tpu.memory_space<vmem>>, vector<1x128xf32>
    %4 = vector.broadcast %3 : vector<1x128xf32> to vector<16x128xf32>
    %5 = arith.addf %2, %4 : vector<16x128xf32>
    %cst_5 = arith.constant dense<0.000000e+00> : vector<16xf32>
    %6 = vector.multi_reduction <add>, %5, %cst_5 [1] : vector<16x128xf32> to vector<16xf32>
    %7 = vector.shape_cast %6 : vector<16xf32> to vector<16x1xf32>
    %cst_6 = arith.constant 1.280000e+02 : f32
    %8 = vector.broadcast %cst_6 : f32 to vector<16x1xf32>
    %9 = arith.divf %7, %8 : vector<16x1xf32>
    %10 = arith.mulf %5, %5 : vector<16x128xf32>
    %cst_7 = arith.constant dense<0.000000e+00> : vector<16xf32>
    %11 = vector.multi_reduction <add>, %10, %cst_7 [1] : vector<16x128xf32> to vector<16xf32>
    %12 = vector.shape_cast %11 : vector<16xf32> to vector<16x1xf32>
    %cst_8 = arith.constant 1.280000e+02 : f32
    %13 = vector.broadcast %cst_8 : f32 to vector<16x1xf32>
    %14 = arith.divf %12, %13 : vector<16x1xf32>
    %15 = arith.mulf %9, %9 : vector<16x1xf32>
    %16 = arith.subf %14, %15 : vector<16x1xf32>
    %cst_9 = arith.constant 0.000000e+00 : f32
    %17 = vector.broadcast %cst_9 : f32 to vector<16x1xf32>
    %18 = arith.maximumf %16, %17 : vector<16x1xf32>
    %19 = vector.broadcast %9 : vector<16x1xf32> to vector<16x128xf32>
    %20 = arith.subf %5, %19 : vector<16x128xf32>
    %cst_10 = arith.constant 9.99999974E-6 : f32
    %21 = vector.broadcast %cst_10 : f32 to vector<16x1xf32>
    %22 = arith.addf %18, %21 : vector<16x1xf32>
    %23 = math.rsqrt %22 : vector<16x1xf32>
    %24 = vector.broadcast %23 : vector<16x1xf32> to vector<16x128xf32>
    %25 = arith.mulf %20, %24 : vector<16x128xf32>
    %c0_11 = arith.constant 0 : index
    %c0_12 = arith.constant 0 : index
    %26 = vector.load %arg4[%c0_11, %c0_12] : memref<1x128xf32, #tpu.memory_space<vmem>>, vector<1x128xf32>
    %27 = vector.broadcast %26 : vector<1x128xf32> to vector<16x128xf32>
    %28 = arith.mulf %25, %27 : vector<16x128xf32>
    %c0_13 = arith.constant 0 : index
    %c0_14 = arith.constant 0 : index
    %29 = vector.load %arg5[%c0_13, %c0_14] : memref<1x128xf32, #tpu.memory_space<vmem>>, vector<1x128xf32>
    %30 = vector.broadcast %29 : vector<1x128xf32> to vector<16x128xf32>
    %31 = arith.addf %28, %30 : vector<16x128xf32>
    %cst_15 = arith.constant 0.000000e+00 : f32
    %32 = vector.broadcast %cst_15 : f32 to vector<16x128xf32>
    %33 = arith.maximumf %31, %32 : vector<16x128xf32>
    %34 = arith.truncf %33 : vector<16x128xf32> to vector<16x128xbf16>
    %c0_16 = arith.constant 0 : index
    %c0_17 = arith.constant 0 : index
    %35 = vector.load %arg6[%c0_16, %c0_17] : memref<128x256xbf16, #tpu.memory_space<vmem>>, vector<128x256xbf16>
    %cst_18 = arith.constant dense<0.000000e+00> : vector<16x256xf32>
    %36 = tpu.matmul %34, %35, %cst_18 {dimension_numbers = #tpu.dot_dimension_numbers<[1], [0], [0], [1], [0, 0, 1, 1], [], []>} : vector<16x128xbf16>, vector<128x256xbf16>, vector<16x256xf32> -> vector<16x256xf32>
    %c0_19 = arith.constant 0 : index
    %c0_20 = arith.constant 0 : index
    %37 = vector.load %arg7[%c0_19, %c0_20] : memref<1x256xf32, #tpu.memory_space<vmem>>, vector<1x256xf32>
    %38 = vector.broadcast %37 : vector<1x256xf32> to vector<16x256xf32>
    %39 = arith.addf %36, %38 : vector<16x256xf32>
    %cst_21 = arith.constant dense<0.000000e+00> : vector<16xf32>
    %40 = vector.multi_reduction <add>, %39, %cst_21 [1] : vector<16x256xf32> to vector<16xf32>
    %41 = vector.shape_cast %40 : vector<16xf32> to vector<16x1xf32>
    %cst_22 = arith.constant 2.560000e+02 : f32
    %42 = vector.broadcast %cst_22 : f32 to vector<16x1xf32>
    %43 = arith.divf %41, %42 : vector<16x1xf32>
    %44 = arith.mulf %39, %39 : vector<16x256xf32>
    %cst_23 = arith.constant dense<0.000000e+00> : vector<16xf32>
    %45 = vector.multi_reduction <add>, %44, %cst_23 [1] : vector<16x256xf32> to vector<16xf32>
    %46 = vector.shape_cast %45 : vector<16xf32> to vector<16x1xf32>
    %cst_24 = arith.constant 2.560000e+02 : f32
    %47 = vector.broadcast %cst_24 : f32 to vector<16x1xf32>
    %48 = arith.divf %46, %47 : vector<16x1xf32>
    %49 = arith.mulf %43, %43 : vector<16x1xf32>
    %50 = arith.subf %48, %49 : vector<16x1xf32>
    %cst_25 = arith.constant 0.000000e+00 : f32
    %51 = vector.broadcast %cst_25 : f32 to vector<16x1xf32>
    %52 = arith.maximumf %50, %51 : vector<16x1xf32>
    %53 = vector.broadcast %43 : vector<16x1xf32> to vector<16x256xf32>
    %54 = arith.subf %39, %53 : vector<16x256xf32>
    %cst_26 = arith.constant 9.99999974E-6 : f32
    %55 = vector.broadcast %cst_26 : f32 to vector<16x1xf32>
    %56 = arith.addf %52, %55 : vector<16x1xf32>
    %57 = math.rsqrt %56 : vector<16x1xf32>
    %58 = vector.broadcast %57 : vector<16x1xf32> to vector<16x256xf32>
    %59 = arith.mulf %54, %58 : vector<16x256xf32>
    %c0_27 = arith.constant 0 : index
    %c0_28 = arith.constant 0 : index
    %60 = vector.load %arg8[%c0_27, %c0_28] : memref<1x256xf32, #tpu.memory_space<vmem>>, vector<1x256xf32>
    %61 = vector.broadcast %60 : vector<1x256xf32> to vector<16x256xf32>
    %62 = arith.mulf %59, %61 : vector<16x256xf32>
    %c0_29 = arith.constant 0 : index
    %c0_30 = arith.constant 0 : index
    %63 = vector.load %arg9[%c0_29, %c0_30] : memref<1x256xf32, #tpu.memory_space<vmem>>, vector<1x256xf32>
    %64 = vector.broadcast %63 : vector<1x256xf32> to vector<16x256xf32>
    %65 = arith.addf %62, %64 : vector<16x256xf32>
    %cst_31 = arith.constant 0.000000e+00 : f32
    %66 = vector.broadcast %cst_31 : f32 to vector<16x256xf32>
    %67 = arith.maximumf %65, %66 : vector<16x256xf32>
    %68 = arith.truncf %67 : vector<16x256xf32> to vector<16x256xbf16>
    %c0_32 = arith.constant 0 : index
    %c0_33 = arith.constant 0 : index
    %69 = vector.load %arg10[%c0_32, %c0_33] : memref<256x512xbf16, #tpu.memory_space<vmem>>, vector<256x512xbf16>
    %cst_34 = arith.constant dense<0.000000e+00> : vector<16x512xf32>
    %70 = tpu.matmul %68, %69, %cst_34 {dimension_numbers = #tpu.dot_dimension_numbers<[1], [0], [0], [1], [0, 0, 1, 1], [], []>} : vector<16x256xbf16>, vector<256x512xbf16>, vector<16x512xf32> -> vector<16x512xf32>
    %c0_35 = arith.constant 0 : index
    %c0_36 = arith.constant 0 : index
    %71 = vector.load %arg11[%c0_35, %c0_36] : memref<1x512xf32, #tpu.memory_space<vmem>>, vector<1x512xf32>
    %72 = vector.broadcast %71 : vector<1x512xf32> to vector<16x512xf32>
    %73 = arith.addf %70, %72 : vector<16x512xf32>
    %cst_37 = arith.constant dense<0.000000e+00> : vector<16xf32>
    %74 = vector.multi_reduction <add>, %73, %cst_37 [1] : vector<16x512xf32> to vector<16xf32>
    %75 = vector.shape_cast %74 : vector<16xf32> to vector<16x1xf32>
    %cst_38 = arith.constant 5.120000e+02 : f32
    %76 = vector.broadcast %cst_38 : f32 to vector<16x1xf32>
    %77 = arith.divf %75, %76 : vector<16x1xf32>
    %78 = arith.mulf %73, %73 : vector<16x512xf32>
    %cst_39 = arith.constant dense<0.000000e+00> : vector<16xf32>
    %79 = vector.multi_reduction <add>, %78, %cst_39 [1] : vector<16x512xf32> to vector<16xf32>
    %80 = vector.shape_cast %79 : vector<16xf32> to vector<16x1xf32>
    %cst_40 = arith.constant 5.120000e+02 : f32
    %81 = vector.broadcast %cst_40 : f32 to vector<16x1xf32>
    %82 = arith.divf %80, %81 : vector<16x1xf32>
    %83 = arith.mulf %77, %77 : vector<16x1xf32>
    %84 = arith.subf %82, %83 : vector<16x1xf32>
    %cst_41 = arith.constant 0.000000e+00 : f32
    %85 = vector.broadcast %cst_41 : f32 to vector<16x1xf32>
    %86 = arith.maximumf %84, %85 : vector<16x1xf32>
    %87 = vector.broadcast %77 : vector<16x1xf32> to vector<16x512xf32>
    %88 = arith.subf %73, %87 : vector<16x512xf32>
    %cst_42 = arith.constant 9.99999974E-6 : f32
    %89 = vector.broadcast %cst_42 : f32 to vector<16x1xf32>
    %90 = arith.addf %86, %89 : vector<16x1xf32>
    %91 = math.rsqrt %90 : vector<16x1xf32>
    %92 = vector.broadcast %91 : vector<16x1xf32> to vector<16x512xf32>
    %93 = arith.mulf %88, %92 : vector<16x512xf32>
    %c0_43 = arith.constant 0 : index
    %c0_44 = arith.constant 0 : index
    %94 = vector.load %arg12[%c0_43, %c0_44] : memref<1x512xf32, #tpu.memory_space<vmem>>, vector<1x512xf32>
    %95 = vector.broadcast %94 : vector<1x512xf32> to vector<16x512xf32>
    %96 = arith.mulf %93, %95 : vector<16x512xf32>
    %c0_45 = arith.constant 0 : index
    %c0_46 = arith.constant 0 : index
    %97 = vector.load %arg13[%c0_45, %c0_46] : memref<1x512xf32, #tpu.memory_space<vmem>>, vector<1x512xf32>
    %98 = vector.broadcast %97 : vector<1x512xf32> to vector<16x512xf32>
    %99 = arith.addf %96, %98 : vector<16x512xf32>
    %cst_47 = arith.constant 0.000000e+00 : f32
    %100 = vector.broadcast %cst_47 : f32 to vector<16x512xf32>
    %101 = arith.maximumf %99, %100 : vector<16x512xf32>
    %102 = arith.truncf %101 : vector<16x512xf32> to vector<16x512xbf16>
    %c0_48 = arith.constant 0 : index
    %c0_49 = arith.constant 0 : index
    %103 = vector.load %arg14[%c0_48, %c0_49] : memref<512x256xbf16, #tpu.memory_space<vmem>>, vector<512x256xbf16>
    %cst_50 = arith.constant dense<0.000000e+00> : vector<16x256xf32>
    %104 = tpu.matmul %102, %103, %cst_50 {dimension_numbers = #tpu.dot_dimension_numbers<[1], [0], [0], [1], [0, 0, 1, 1], [], []>} : vector<16x512xbf16>, vector<512x256xbf16>, vector<16x256xf32> -> vector<16x256xf32>
    %c0_51 = arith.constant 0 : index
    %c0_52 = arith.constant 0 : index
    %105 = vector.load %arg15[%c0_51, %c0_52] : memref<1x256xf32, #tpu.memory_space<vmem>>, vector<1x256xf32>
    %106 = vector.broadcast %105 : vector<1x256xf32> to vector<16x256xf32>
    %107 = arith.addf %104, %106 : vector<16x256xf32>
    %cst_53 = arith.constant dense<0.000000e+00> : vector<16xf32>
    %108 = vector.multi_reduction <add>, %107, %cst_53 [1] : vector<16x256xf32> to vector<16xf32>
    %109 = vector.shape_cast %108 : vector<16xf32> to vector<16x1xf32>
    %cst_54 = arith.constant 2.560000e+02 : f32
    %110 = vector.broadcast %cst_54 : f32 to vector<16x1xf32>
    %111 = arith.divf %109, %110 : vector<16x1xf32>
    %112 = arith.mulf %107, %107 : vector<16x256xf32>
    %cst_55 = arith.constant dense<0.000000e+00> : vector<16xf32>
    %113 = vector.multi_reduction <add>, %112, %cst_55 [1] : vector<16x256xf32> to vector<16xf32>
    %114 = vector.shape_cast %113 : vector<16xf32> to vector<16x1xf32>
    %cst_56 = arith.constant 2.560000e+02 : f32
    %115 = vector.broadcast %cst_56 : f32 to vector<16x1xf32>
    %116 = arith.divf %114, %115 : vector<16x1xf32>
    %117 = arith.mulf %111, %111 : vector<16x1xf32>
    %118 = arith.subf %116, %117 : vector<16x1xf32>
    %cst_57 = arith.constant 0.000000e+00 : f32
    %119 = vector.broadcast %cst_57 : f32 to vector<16x1xf32>
    %120 = arith.maximumf %118, %119 : vector<16x1xf32>
    %121 = vector.broadcast %111 : vector<16x1xf32> to vector<16x256xf32>
    %122 = arith.subf %107, %121 : vector<16x256xf32>
    %cst_58 = arith.constant 9.99999974E-6 : f32
    %123 = vector.broadcast %cst_58 : f32 to vector<16x1xf32>
    %124 = arith.addf %120, %123 : vector<16x1xf32>
    %125 = math.rsqrt %124 : vector<16x1xf32>
    %126 = vector.broadcast %125 : vector<16x1xf32> to vector<16x256xf32>
    %127 = arith.mulf %122, %126 : vector<16x256xf32>
    %c0_59 = arith.constant 0 : index
    %c0_60 = arith.constant 0 : index
    %128 = vector.load %arg16[%c0_59, %c0_60] : memref<1x256xf32, #tpu.memory_space<vmem>>, vector<1x256xf32>
    %129 = vector.broadcast %128 : vector<1x256xf32> to vector<16x256xf32>
    %130 = arith.mulf %127, %129 : vector<16x256xf32>
    %c0_61 = arith.constant 0 : index
    %c0_62 = arith.constant 0 : index
    %131 = vector.load %arg17[%c0_61, %c0_62] : memref<1x256xf32, #tpu.memory_space<vmem>>, vector<1x256xf32>
    %132 = vector.broadcast %131 : vector<1x256xf32> to vector<16x256xf32>
    %133 = arith.addf %130, %132 : vector<16x256xf32>
    %cst_63 = arith.constant 0.000000e+00 : f32
    %134 = vector.broadcast %cst_63 : f32 to vector<16x256xf32>
    %135 = arith.maximumf %133, %134 : vector<16x256xf32>
    %136 = arith.truncf %135 : vector<16x256xf32> to vector<16x256xbf16>
    %c0_64 = arith.constant 0 : index
    %c0_65 = arith.constant 0 : index
    %137 = vector.load %arg18[%c0_64, %c0_65] : memref<256x128xbf16, #tpu.memory_space<vmem>>, vector<256x128xbf16>
    %cst_66 = arith.constant dense<0.000000e+00> : vector<16x128xf32>
    %138 = tpu.matmul %136, %137, %cst_66 {dimension_numbers = #tpu.dot_dimension_numbers<[1], [0], [0], [1], [0, 0, 1, 1], [], []>} : vector<16x256xbf16>, vector<256x128xbf16>, vector<16x128xf32> -> vector<16x128xf32>
    %c0_67 = arith.constant 0 : index
    %c0_68 = arith.constant 0 : index
    %139 = vector.load %arg19[%c0_67, %c0_68] : memref<1x128xf32, #tpu.memory_space<vmem>>, vector<1x128xf32>
    %140 = vector.broadcast %139 : vector<1x128xf32> to vector<16x128xf32>
    %141 = arith.addf %138, %140 : vector<16x128xf32>
    %cst_69 = arith.constant dense<0.000000e+00> : vector<16xf32>
    %142 = vector.multi_reduction <add>, %141, %cst_69 [1] : vector<16x128xf32> to vector<16xf32>
    %143 = vector.shape_cast %142 : vector<16xf32> to vector<16x1xf32>
    %cst_70 = arith.constant 1.280000e+02 : f32
    %144 = vector.broadcast %cst_70 : f32 to vector<16x1xf32>
    %145 = arith.divf %143, %144 : vector<16x1xf32>
    %146 = arith.mulf %141, %141 : vector<16x128xf32>
    %cst_71 = arith.constant dense<0.000000e+00> : vector<16xf32>
    %147 = vector.multi_reduction <add>, %146, %cst_71 [1] : vector<16x128xf32> to vector<16xf32>
    %148 = vector.shape_cast %147 : vector<16xf32> to vector<16x1xf32>
    %cst_72 = arith.constant 1.280000e+02 : f32
    %149 = vector.broadcast %cst_72 : f32 to vector<16x1xf32>
    %150 = arith.divf %148, %149 : vector<16x1xf32>
    %151 = arith.mulf %145, %145 : vector<16x1xf32>
    %152 = arith.subf %150, %151 : vector<16x1xf32>
    %cst_73 = arith.constant 0.000000e+00 : f32
    %153 = vector.broadcast %cst_73 : f32 to vector<16x1xf32>
    %154 = arith.maximumf %152, %153 : vector<16x1xf32>
    %155 = vector.broadcast %145 : vector<16x1xf32> to vector<16x128xf32>
    %156 = arith.subf %141, %155 : vector<16x128xf32>
    %cst_74 = arith.constant 9.99999974E-6 : f32
    %157 = vector.broadcast %cst_74 : f32 to vector<16x1xf32>
    %158 = arith.addf %154, %157 : vector<16x1xf32>
    %159 = math.rsqrt %158 : vector<16x1xf32>
    %160 = vector.broadcast %159 : vector<16x1xf32> to vector<16x128xf32>
    %161 = arith.mulf %156, %160 : vector<16x128xf32>
    %c0_75 = arith.constant 0 : index
    %c0_76 = arith.constant 0 : index
    %162 = vector.load %arg20[%c0_75, %c0_76] : memref<1x128xf32, #tpu.memory_space<vmem>>, vector<1x128xf32>
    %163 = vector.broadcast %162 : vector<1x128xf32> to vector<16x128xf32>
    %164 = arith.mulf %161, %163 : vector<16x128xf32>
    %c0_77 = arith.constant 0 : index
    %c0_78 = arith.constant 0 : index
    %165 = vector.load %arg21[%c0_77, %c0_78] : memref<1x128xf32, #tpu.memory_space<vmem>>, vector<1x128xf32>
    %166 = vector.broadcast %165 : vector<1x128xf32> to vector<16x128xf32>
    %167 = arith.addf %164, %166 : vector<16x128xf32>
    %cst_79 = arith.constant 0.000000e+00 : f32
    %168 = vector.broadcast %cst_79 : f32 to vector<16x128xf32>
    %169 = arith.maximumf %167, %168 : vector<16x128xf32>
    %170 = arith.truncf %169 : vector<16x128xf32> to vector<16x128xbf16>
    %c0_80 = arith.constant 0 : index
    %c0_81 = arith.constant 0 : index
    %171 = vector.load %arg22[%c0_80, %c0_81] : memref<128x128xbf16, #tpu.memory_space<vmem>>, vector<128x128xbf16>
    %cst_82 = arith.constant dense<0.000000e+00> : vector<16x128xf32>
    %172 = tpu.matmul %170, %171, %cst_82 {dimension_numbers = #tpu.dot_dimension_numbers<[1], [0], [0], [1], [0, 0, 1, 1], [], []>} : vector<16x128xbf16>, vector<128x128xbf16>, vector<16x128xf32> -> vector<16x128xf32>
    %c0_83 = arith.constant 0 : index
    %c0_84 = arith.constant 0 : index
    %173 = vector.load %arg23[%c0_83, %c0_84] : memref<1x128xf32, #tpu.memory_space<vmem>>, vector<1x128xf32>
    %174 = vector.broadcast %173 : vector<1x128xf32> to vector<16x128xf32>
    %175 = arith.addf %172, %174 : vector<16x128xf32>
    %c0_85 = arith.constant 0 : index
    %c0_86 = arith.constant 0 : index
    %176 = vector.load %arg24[%c0_85, %c0_86] : memref<16x128xf32, #tpu.memory_space<vmem>>, vector<16x128xf32>
    tpu.vector_store %arg24[%c0_85, %c0_86], %175 {strides = array<i32>} : memref<16x128xf32, #tpu.memory_space<vmem>>, vector<16x128xf32>,
    return
  }
  func.func @transform_0(%arg0: i32) -> (i32, i32) {
    %c0_i32 = arith.constant 0 : i32
    %c0_i32_0 = arith.constant 0 : i32
    return %arg0, %c0_i32 : i32, i32
  }
  func.func @transform_1(%arg0: i32) -> (i32, i32) {
    %c0_i32 = arith.constant 0 : i32
    %c0_i32_0 = arith.constant 0 : i32
    %c0_i32_1 = arith.constant 0 : i32
    return %c0_i32, %c0_i32_0 : i32, i32
  }
  func.func @transform_2(%arg0: i32) -> (i32, i32) {
    %c0_i32 = arith.constant 0 : i32
    %c0_i32_0 = arith.constant 0 : i32
    %c0_i32_1 = arith.constant 0 : i32
    return %c0_i32, %c0_i32_0 : i32, i32
  }
  func.func @transform_3(%arg0: i32) -> (i32, i32) {
    %c0_i32 = arith.constant 0 : i32
    %c0_i32_0 = arith.constant 0 : i32
    %c0_i32_1 = arith.constant 0 : i32
    return %c0_i32, %c0_i32_0 : i32, i32
  }
  func.func @transform_4(%arg0: i32) -> (i32, i32) {
    %c0_i32 = arith.constant 0 : i32
    %c0_i32_0 = arith.constant 0 : i32
    %c0_i32_1 = arith.constant 0 : i32
    return %c0_i32, %c0_i32_0 : i32, i32
  }
  func.func @transform_5(%arg0: i32) -> (i32, i32) {
    %c0_i32 = arith.constant 0 : i32
    %c0_i32_0 = arith.constant 0 : i32
    %c0_i32_1 = arith.constant 0 : i32
    return %c0_i32, %c0_i32_0 : i32, i32
  }
  func.func @transform_6(%arg0: i32) -> (i32, i32) {
    %c0_i32 = arith.constant 0 : i32
    %c0_i32_0 = arith.constant 0 : i32
    %c0_i32_1 = arith.constant 0 : i32
    return %c0_i32, %c0_i32_0 : i32, i32
  }
  func.func @transform_7(%arg0: i32) -> (i32, i32) {
    %c0_i32 = arith.constant 0 : i32
    %c0_i32_0 = arith.constant 0 : i32
    %c0_i32_1 = arith.constant 0 : i32
    return %c0_i32, %c0_i32_0 : i32, i32
  }
  func.func @transform_8(%arg0: i32) -> (i32, i32) {
    %c0_i32 = arith.constant 0 : i32
    %c0_i32_0 = arith.constant 0 : i32
    %c0_i32_1 = arith.constant 0 : i32
    return %c0_i32, %c0_i32_0 : i32, i32
  }
  func.func @transform_9(%arg0: i32) -> (i32, i32) {
    %c0_i32 = arith.constant 0 : i32
    %c0_i32_0 = arith.constant 0 : i32
    %c0_i32_1 = arith.constant 0 : i32
    return %c0_i32, %c0_i32_0 : i32, i32
  }
  func.func @transform_10(%arg0: i32) -> (i32, i32) {
    %c0_i32 = arith.constant 0 : i32
    %c0_i32_0 = arith.constant 0 : i32
    %c0_i32_1 = arith.constant 0 : i32
    return %c0_i32, %c0_i32_0 : i32, i32
  }
  func.func @transform_11(%arg0: i32) -> (i32, i32) {
    %c0_i32 = arith.constant 0 : i32
    %c0_i32_0 = arith.constant 0 : i32
    %c0_i32_1 = arith.constant 0 : i32
    return %c0_i32, %c0_i32_0 : i32, i32
  }
  func.func @transform_12(%arg0: i32) -> (i32, i32) {
    %c0_i32 = arith.constant 0 : i32
    %c0_i32_0 = arith.constant 0 : i32
    %c0_i32_1 = arith.constant 0 : i32
    return %c0_i32, %c0_i32_0 : i32, i32
  }
  func.func @transform_13(%arg0: i32) -> (i32, i32) {
    %c0_i32 = arith.constant 0 : i32
    %c0_i32_0 = arith.constant 0 : i32
    %c0_i32_1 = arith.constant 0 : i32
    return %c0_i32, %c0_i32_0 : i32, i32
  }
  func.func @transform_14(%arg0: i32) -> (i32, i32) {
    %c0_i32 = arith.constant 0 : i32
    %c0_i32_0 = arith.constant 0 : i32
    %c0_i32_1 = arith.constant 0 : i32
    return %c0_i32, %c0_i32_0 : i32, i32
  }
  func.func @transform_15(%arg0: i32) -> (i32, i32) {
    %c0_i32 = arith.constant 0 : i32
    %c0_i32_0 = arith.constant 0 : i32
    %c0_i32_1 = arith.constant 0 : i32
    return %c0_i32, %c0_i32_0 : i32, i32
  }
  func.func @transform_16(%arg0: i32) -> (i32, i32) {
    %c0_i32 = arith.constant 0 : i32
    %c0_i32_0 = arith.constant 0 : i32
    %c0_i32_1 = arith.constant 0 : i32
    return %c0_i32, %c0_i32_0 : i32, i32
  }
  func.func @transform_17(%arg0: i32) -> (i32, i32) {
    %c0_i32 = arith.constant 0 : i32
    %c0_i32_0 = arith.constant 0 : i32
    %c0_i32_1 = arith.constant 0 : i32
    return %c0_i32, %c0_i32_0 : i32, i32
  }
  func.func @transform_18(%arg0: i32) -> (i32, i32) {
    %c0_i32 = arith.constant 0 : i32
    %c0_i32_0 = arith.constant 0 : i32
    %c0_i32_1 = arith.constant 0 : i32
    return %c0_i32, %c0_i32_0 : i32, i32
  }
  func.func @transform_19(%arg0: i32) -> (i32, i32) {
    %c0_i32 = arith.constant 0 : i32
    %c0_i32_0 = arith.constant 0 : i32
    %c0_i32_1 = arith.constant 0 : i32
    return %c0_i32, %c0_i32_0 : i32, i32
  }
  func.func @transform_20(%arg0: i32) -> (i32, i32) {
    %c0_i32 = arith.constant 0 : i32
    %c0_i32_0 = arith.constant 0 : i32
    %c0_i32_1 = arith.constant 0 : i32
    return %c0_i32, %c0_i32_0 : i32, i32
  }
  func.func @transform_21(%arg0: i32) -> (i32, i32) {
    %c0_i32 = arith.constant 0 : i32
    %c0_i32_0 = arith.constant 0 : i32
    %c0_i32_1 = arith.constant 0 : i32
    return %c0_i32, %c0_i32_0 : i32, i32
  }
  func.func @transform_22(%arg0: i32) -> (i32, i32) {
    %c0_i32 = arith.constant 0 : i32
    %c0_i32_0 = arith.constant 0 : i32
    %c0_i32_1 = arith.constant 0 : i32
    return %c0_i32, %c0_i32_0 : i32, i32
  }
  func.func @transform_23(%arg0: i32) -> (i32, i32) {
    %c0_i32 = arith.constant 0 : i32
    %c0_i32_0 = arith.constant 0 : i32
    return %arg0, %c0_i32 : i32, i32
  }
}

</mosaic_0001>

<bundles_post_ra>
// kernel: fc_q_forward.1
= control target key start
LH: loop header
LB: loop body
LE: loop exit
PB: predicated region body
PF: predicated region fallthrough
CT: control target
= control target key end

     0   :  { %s3045_s0 = inlined_call_operand.vmem [shape: bf16[16,8], index: 0, kind: input, shape index: {}]   ;;  %s3046_s1 = inlined_call_operand.vmem [shape: bf16[8,128], index: 1, kind: input, shape index: {}]   ;;  %s3047_s2 = inlined_call_operand.vmem [shape: f32[1,128], index: 2, kind: input, shape index: {}]   ;;  %s3048_s3 = inlined_call_operand.vmem [shape: f32[1,128], index: 3, kind: input, shape index: {}]   ;;  %s3049_s4 = inlined_call_operand.vmem [shape: f32[1,128], index: 4, kind: input, shape index: {}]   ;;  %s3050_s5 = inlined_call_operand.hbm [shape: bf16[128,256], index: 5, kind: input, shape index: {}]   ;;  %s3051_s6 = inlined_call_operand.vmem [shape: f32[1,256], index: 6, kind: input, shape index: {}]   ;;  %s3052_s7 = inlined_call_operand.vmem [shape: f32[1,256], index: 7, kind: input, shape index: {}]   ;;  %s3053_s8 = inlined_call_operand.vmem [shape: f32[1,256], index: 8, kind: input, shape index: {}]   ;;  %s3054_s9 = inlined_call_operand.hbm [shape: bf16[256,512], index: 9, kind: input, shape index: {}]   ;;  %s3055_s10 = inlined_call_operand.vmem [shape: f32[1,512], index: 10, kind: input, shape index: {}]   ;;  %s3056_s11 = inlined_call_operand.vmem [shape: f32[1,512], index: 11, kind: input, shape index: {}]   ;;  %s3057_s12 = inlined_call_operand.vmem [shape: f32[1,512], index: 12, kind: input, shape index: {}]   ;;  %s3058_s13 = inlined_call_operand.hbm [shape: bf16[512,256], index: 13, kind: input, shape index: {}]   ;;  %s3059_s14 = inlined_call_operand.vmem [shape: f32[1,256], index: 14, kind: input, shape index: {}]   ;;  %s3060_s15 = inlined_call_operand.vmem [shape: f32[1,256], index: 15, kind: input, shape index: {}]   ;;  %s3061_s16 = inlined_call_operand.vmem [shape: f32[1,256], index: 16, kind: input, shape index: {}]   ;;  %s3062_s17 = inlined_call_operand.hbm [shape: bf16[256,128], index: 17, kind: input, shape index: {}]   ;;  %s3063_s18 = inlined_call_operand.vmem [shape: f32[1,128], index: 18, kind: input, shape index: {}]   ;;  %s3064_s19 = inlined_call_operand.vmem [shape: f32[1,128], index: 19, kind: input, shape index: {}]   ;;  %s3065_s20 = inlined_call_operand.vmem [shape: f32[1,128], index: 20, kind: input, shape index: {}]   ;;  %s3066_s21 = inlined_call_operand.vmem [shape: bf16[128,128], index: 21, kind: input, shape index: {}]   ;;  %s3067_s22 = inlined_call_operand.vmem [shape: f32[1,128], index: 22, kind: input, shape index: {}]   ;;  %s3068_s23 = inlined_call_operand.vmem [shape: f32[16,128], index: 23, kind: output, shape index: {}]  }
   0x1   :  { %3071 = sst [smem:[#allocation12_spill]] %s3045_s0 }
   0x2   :  { %3072 = sst [smem:[#allocation13_spill]] %s3046_s1 }
   0x3   :  { %3073 = sst [smem:[#allocation14_spill]] %s3047_s2 }
   0x4   :  { %3074 = sst [smem:[#allocation15_spill]] %s3048_s3 }
   0x5   :  { %3075 = sst [smem:[#allocation16_spill]] %s3049_s4 }
   0x6   :  { %3076 = sst [smem:[#allocation17_spill]] %s3050_s5 }
   0x7   :  { %3077 = sst [smem:[#allocation18_spill]] %s3051_s6 }
   0x8   :  { %3078 = sst [smem:[#allocation19_spill]] %s3052_s7 }
   0x9   :  { %3079 = sst [smem:[#allocation20_spill]] %s3068_s23 }
   0xa   :  { %28 = vsyncpa [#allocation3], 0 }
   0xb   :  { %29 = vsyncpa [#allocation5], 0 }
   0xc   :  { %30 = vsyncpa [#allocation8], 0  ;;  %s2611_s4 = smov [#allocation4]   ;;  %s2517_s5 = scalar_lea.hbm %s3054_s9, 8192 }
   0xd   :  { %s64_s30 = sshll.u32 %s2611_s4, 4  ;;  %p2518_p0 = scmp.ne.s32.totalorder %s3054_s9, %s2517_s5  ;;  %s65_s30 = int_to_ptr.vmem [resolvable:$true] %s64_s30 }
   0xe   :  { %p2521_p1 = scmp.lt.u32.totalorder %s2517_s5, %s3054_s9 }
  0x10   :  { %p2523_p2 = pnand %p2521_p1, %p2518_p0 }
  0x12   :  { %2526 = shalt.err (!%p2523_p2)
}
  0x13   :  { %s2527_s27 = scalar_lea.vmem %s65_s30, 8192  ;;  %p2532_p4 = scmp.lt.s32.totalorder %s65_s30, %s65_s30 }
  0x14   :  { %p2528_p3 = scmp.ne.s32.totalorder %s65_s30, %s2527_s27  ;;  %p2533_p5 = scmp.lt.s32.totalorder %s2527_s27, %s2527_s27 }
  0x16   :  { %p2534_p6 = por %p2533_p5, %p2532_p4 }
  0x18   :  { %p2535_p7 = pnand %p2534_p6, %p2528_p3 }
  0x1a   :  { %2538 = shalt.err (!%p2535_p7)
}
  0x1b   :  { %s2612_s7 = smov 256   ;;  %s2613_s28 = smov 16  }
  0x1c   :  { %70 = dma.hbm_to_vmem [thread:$0]  %s3054_s9, 8192, %s65_s30, [#allocation5], %s2612_s7, %s2612_s7, %s2613_s28  }
  0x1d   :  { %s2614_s0 = smov [#allocation2]   ;;  %s3080_s5 = sld [smem:[#allocation17_spill]] }
  0x1e   :  { %s46_s4 = sshll.u32 %s2614_s0, 4  ;;  %s47_s4 = int_to_ptr.vmem [resolvable:$true] %s46_s4 }
  0x23   :  { %s2539_s1 = scalar_lea.hbm %s3080_s5, 2048 }
  0x24   :  { %p2540_p8 = scmp.ne.s32.totalorder %s3080_s5, %s2539_s1  ;;  %p2543_p9 = scmp.lt.u32.totalorder %s2539_s1, %s3080_s5 }
  0x26   :  { %p2545_p10 = pnand %p2543_p9, %p2540_p8 }
  0x28   :  { %2548 = shalt.err (!%p2545_p10)
}
  0x29   :  { %s2549_s23 = scalar_lea.vmem %s47_s4, 2048  ;;  %p2554_p12 = scmp.lt.s32.totalorder %s47_s4, %s47_s4 }
  0x2a   :  { %p2550_p11 = scmp.ne.s32.totalorder %s47_s4, %s2549_s23  ;;  %p2555_p13 = scmp.lt.s32.totalorder %s2549_s23, %s2549_s23 }
  0x2c   :  { %p2556_p0 = por %p2555_p13, %p2554_p12 }
  0x2e   :  { %p2557_p1 = pnand %p2556_p0, %p2550_p11 }
  0x30   :  { %2560 = shalt.err (!%p2557_p1)
}
  0x31   :  { %s2615_s9 = smov 128   ;;  %s2616_s30 = smov 8  }
  0x32   :  { %52 = dma.hbm_to_vmem [thread:$0]  %s3080_s5, 2048, %s47_s4, [#allocation3], %s2615_s9, %s2615_s9, %s2616_s30  }
  0x33   :  { %s2617_s29 = smov [#allocation6]   ;;  %s2618_s0 = smov [#allocation7]  }
  0x34   :  { %s82_s3 = sshll.u32 %s2617_s29, 4  ;;  %s100_s24 = sshll.u32 %s2618_s0, 4  ;;  %s83_s3 = int_to_ptr.vmem [resolvable:$true] %s82_s3  ;;  %s2768_s24 = int_to_ptr.vmem [resolvable:$true] %s100_s24 }
  0x35   :  { %s2561_s23 = scalar_lea.hbm %s3058_s13, 8192 }
  0x36   :  { %p2562_p2 = scmp.ne.s32.totalorder %s3058_s13, %s2561_s23  ;;  %p2565_p3 = scmp.lt.u32.totalorder %s2561_s23, %s3058_s13 }
  0x38   :  { %p2567_p4 = pnand %p2565_p3, %p2562_p2 }
  0x3a   :  { %2570 = shalt.err (!%p2567_p4)
}
  0x3b   :  { %s2571_s4 = scalar_lea.vmem %s83_s3, 8192  ;;  %p2576_p6 = scmp.lt.s32.totalorder %s83_s3, %s83_s3 }
  0x3c   :  { %p2572_p5 = scmp.ne.s32.totalorder %s83_s3, %s2571_s4  ;;  %p2577_p7 = scmp.lt.s32.totalorder %s2571_s4, %s2571_s4 }
  0x3e   :  { %p2578_p8 = por %p2577_p7, %p2576_p6 }
  0x40   :  { %p2579_p9 = pnand %p2578_p8, %p2572_p5 }
  0x42   :  { %2582 = shalt.err (!%p2579_p9)
}
  0x43   :  { %88 = dma.hbm_to_vmem [thread:$0]  %s3058_s13, 8192, %s83_s3, [#allocation5], %s2615_s9, %s2615_s9, %s2616_s30  }
  0x44   :  { %s2583_s0 = scalar_lea.hbm %s3062_s17, 2048 }
  0x45   :  { %p2584_p10 = scmp.ne.s32.totalorder %s3062_s17, %s2583_s0  ;;  %p2587_p11 = scmp.lt.u32.totalorder %s2583_s0, %s3062_s17 }
  0x47   :  { %p2589_p12 = pnand %p2587_p11, %p2584_p10 }
  0x49   :  { %2592 = shalt.err (!%p2589_p12)
}
  0x4a   :  { %s2593_s2 = scalar_lea.vmem %s2768_s24, 2048  ;;  %p2598_p0 = scmp.lt.s32.totalorder %s2768_s24, %s2768_s24 }
  0x4b   :  { %p2594_p13 = scmp.ne.s32.totalorder %s2768_s24, %s2593_s2  ;;  %p2599_p1 = scmp.lt.s32.totalorder %s2593_s2, %s2593_s2 }
  0x4d   :  { %p2600_p2 = por %p2599_p1, %p2598_p0 }
  0x4f   :  { %p2601_p3 = pnand %p2600_p2, %p2594_p13 }
  0x51   :  { %2604 = shalt.err (!%p2601_p3)
}
  0x52   :  { %s2619_s13 = smov 64   ;;  %s2620_s9 = smov 4  }
  0x53   :  { %106 = dma.hbm_to_vmem [thread:$0]  %s3062_s17, 2048, %s2768_s24, [#allocation8], %s2619_s13, %s2619_s13, %s2620_s9  }
  0x54   :  { %2605 = dma.done.wait [#allocation3], 2048  }
  0x55   :  { %2606 = vsyncadd [#allocation3], 4294965248 }
  0x56   :  { %2607 = dma.done.wait [#allocation5], 16384  }
  0x57   :  { %2608 = vsyncadd [#allocation5], 4294950912 }
  0x58   :  { %2609 = dma.done.wait [#allocation8], 2048  }
  0x59   :  { %2610 = vsyncadd [#allocation8], 4294965248  ;;  %v2621_v0 = vmov 0.0   ;;  %vm2622_vm0 = vmmov 0   ;;  %vm149_vm1 = vcmask 1043456   ;;  %s3081_s4 = sld [smem:[#allocation13_spill]] }
  0x5a   :  { %2209 = vmatprep.subr.bf16.mxu1 %v2621_v0  ;;  %2211 = vmatprep.mubr.msk.bf16.mxu1 %vm2622_vm0, %v2621_v0  ;;  %s3082_s5 = sld [smem:[#allocation12_spill]]  ;;  %vm145_vm2 = vcmask 64512   ;;  %s3083_s29 = sld [smem:[#allocation14_spill]]  ;;  %v2259_v13 = vld [vmem:[#allocation2 + $0x4] ss:$8 sps:$4 sm:$0xff]   ;;  %v2623_v24 = vmov 0  }
  0x5b   :  { %v2257_v14 = vld [vmem:[#allocation2] ss:$8 sps:$4 sm:$0xff]   ;;  %v2262_v15 = vld [vmem:[#allocation2 + $0x14] ss:$8 sps:$4 sm:$0xff]   ;;  %v2260_v16 = vld [vmem:[#allocation2 + $0x10] ss:$8 sps:$4 sm:$0xff]  }
  0x5c   :  { %v2265_v17 = vld [vmem:[#allocation2 + $0x24] ss:$8 sps:$4 sm:$0xff]   ;;  %v2263_v18 = vld [vmem:[#allocation2 + $0x20] ss:$8 sps:$4 sm:$0xff]   ;;  %v2268_v19 = vld [vmem:[#allocation2 + $0x34] ss:$8 sps:$4 sm:$0xff]  }
  0x5d   :  { %v2266_v20 = vld [vmem:[#allocation2 + $0x30] ss:$8 sps:$4 sm:$0xff]   ;;  %v2271_v21 = vld [vmem:[#allocation2 + $0x44] ss:$8 sps:$4 sm:$0xff]   ;;  %v2269_v22 = vld [vmem:[#allocation2 + $0x40] ss:$8 sps:$4 sm:$0xff]  }
  0x5e   :  { %v2274_v23 = vld [vmem:[#allocation2 + $0x54] ss:$8 sps:$4 sm:$0xff]   ;;  %v2272_v25 = vld [vmem:[#allocation2 + $0x50] ss:$8 sps:$4 sm:$0xff]   ;;  %v2277_v26 = vld [vmem:[#allocation2 + $0x64] ss:$8 sps:$4 sm:$0xff]  }
  0x5f   :  { %v132_v1 = vld [vmem:[%s3081_s4] sm:$0xf]  ;;  %v2280_v28 = vld [vmem:[#allocation2 + $0x74] ss:$8 sps:$4 sm:$0xff]   ;;  %v2278_v29 = vld [vmem:[#allocation2 + $0x70] ss:$8 sps:$4 sm:$0xff]  }
  0x60   :  { %v151_v2 = vsel %vm149_vm1, %v132_v1, 0  ;;  %v2256_v3 = vld [vmem:[%s3082_s5] sm:$0xff]   ;;  %s3084_s1 = sld [smem:[#allocation15_spill]]  ;;  %s3085_s2 = sld [smem:[#allocation16_spill]]  ;;  %v2283_v62 = vld [vmem:[#allocation4 + $0x8] ss:$16 sps:$4 sm:$0xff]  }
  0x61   :  { %2210 = vmatpush3.bf16.msra.mxu1 %v151_v2  ;;  %v1999_v4 = vld [vmem:[%s3083_s29] ss:$0 sm:$0xff]  ;;  %v2281_v61 = vld [vmem:[#allocation4 + $0x4] ss:$16 sps:$4 sm:$0xff]   ;;  %v2285_v63 = vld [vmem:[#allocation4 + $0xc] ss:$16 sps:$4 sm:$0xff]  }
  0x62   :  { %352 = vmatprep.subr.bf16.mxu1 %v2259_v13  ;;  %v2275_v27 = vld [vmem:[#allocation2 + $0x60] ss:$8 sps:$4 sm:$0xff]   ;;  %v2287_v2 = vld [vmem:[#allocation4 + $0x24] ss:$16 sps:$4 sm:$0xff]   ;;  %878 = vmatprep.subr.bf16.mxu0 %v2281_v61  ;;  %s3086_s30 = sld [smem:[#allocation18_spill]]  ;;  %s3087_s27 = sld [smem:[#allocation19_spill]] }
  0x63   :  { %v2286_v1 = vld [vmem:[#allocation4] ss:$16 sps:$4 sm:$0xff]   ;;  %v2341_v61 = vld [vmem:[#allocation4 + $0x144] ss:$16 sps:$4 sm:$0xff]  }
  0x64   :  { %2212 = vmatmul.mubr.msk.bf16.vlgmr.msra.gmra.mrb[0].mxu1 %vm145_vm2, %v2256_v3  ;;  %v2291_v3 = vld [vmem:[#allocation4 + $0x2c] ss:$16 sps:$4 sm:$0xff]   ;;  %879 = vmatpush1.bf16.msra.mxu0 %v2286_v1  ;;  %v2304_v13 = vld [vmem:[#allocation4 + $0x60] ss:$16 sps:$4 sm:$0xff]  }
  0x65   :  { %353 = vmatpush1.bf16.msra.mxu1 %v2257_v14  ;;  %384 = vmatprep.mubr.bf16.mxu1 %v2623_v24  ;;  %v2305_v14 = vld [vmem:[#allocation4 + $0x84] ss:$16 sps:$4 sm:$0xff]   ;;  %v2319_v24 = vld [vmem:[#allocation4 + $0xc8] ss:$16 sps:$4 sm:$0xff]   ;;  %v2346_v1 = vld [vmem:[#allocation4 + $0x140] ss:$16 sps:$4 sm:$0xff]  }
  0x66   :  { %354 = vmatprep.subr.bf16.mxu1 %v2262_v15  ;;  %v2002_v48 = vld [vmem:[%s3084_s1] ss:$0 sm:$0xff]  ;;  %880 = vmatprep.subr.bf16.mxu0 %v2287_v2  ;;  %v2309_v15 = vld [vmem:[#allocation4 + $0x8c] ss:$16 sps:$4 sm:$0xff]   ;;  %v2347_v2 = vld [vmem:[#allocation4 + $0x164] ss:$16 sps:$4 sm:$0xff]  }
  0x67   :  { %v2003_v53 = vld [vmem:[%s3085_s2] ss:$0 sm:$0xff] }
  0x69   :  { %355 = vmatpush1.bf16.msra.mxu1 %v2260_v16  ;;  %v2307_v16 = vld [vmem:[#allocation4 + $0x88] ss:$16 sps:$4 sm:$0xff]  }
  0x6a   :  { %356 = vmatprep.subr.bf16.mxu1 %v2265_v17  ;;  %v2310_v17 = vld [vmem:[#allocation4 + $0x80] ss:$16 sps:$4 sm:$0xff]  }
  0x6d   :  { %357 = vmatpush1.bf16.msra.mxu1 %v2263_v18  ;;  %v2311_v18 = vld [vmem:[#allocation4 + $0xa4] ss:$16 sps:$4 sm:$0xff]  }
  0x6e   :  { %358 = vmatprep.subr.bf16.mxu1 %v2268_v19  ;;  %v2315_v19 = vld [vmem:[#allocation4 + $0xac] ss:$16 sps:$4 sm:$0xff]  }
  0x71   :  { %359 = vmatpush1.bf16.msra.mxu1 %v2266_v20  ;;  %v2313_v20 = vld [vmem:[#allocation4 + $0xa8] ss:$16 sps:$4 sm:$0xff]  }
  0x72   :  { %360 = vmatprep.subr.bf16.mxu1 %v2271_v21  ;;  %v2316_v21 = vld [vmem:[#allocation4 + $0xa0] ss:$16 sps:$4 sm:$0xff]  }
  0x75   :  { %361 = vmatpush1.bf16.msra.mxu1 %v2269_v22  ;;  %v2317_v22 = vld [vmem:[#allocation4 + $0xc4] ss:$16 sps:$4 sm:$0xff]  }
  0x76   :  { %362 = vmatprep.subr.bf16.mxu1 %v2274_v23  ;;  %v2321_v23 = vld [vmem:[#allocation4 + $0xcc] ss:$16 sps:$4 sm:$0xff]  }
  0x79   :  { %363 = vmatpush1.bf16.msra.mxu1 %v2272_v25  ;;  %v2322_v25 = vld [vmem:[#allocation4 + $0xc0] ss:$16 sps:$4 sm:$0xff]  }
  0x7a   :  { %364 = vmatprep.subr.bf16.mxu1 %v2277_v26  ;;  %v262_v26 = vlaneseq }
  0x7d   :  { %365 = vmatpush1.bf16.msra.mxu1 %v2275_v27  ;;  %v2829_v27 = vshrl.u32 %v262_v26, 7 }
  0x7e   :  { %366 = vmatprep.subr.bf16.mxu1 %v2280_v28 }
  0x7f   :  { %v2832_v28 = vsub.s32 0, %v2829_v27 }
  0x81   :  { %367 = vmatpush1.bf16.msra.mxu1 %v2278_v29  ;;  %v260_v29 = vld [vmem:[%s3086_s30] sm:$0x3] }
  0x82   :  { %921 = vmatprep.subr.bf16.mxu1 %v2285_v63  ;;  %v2343_v63 = vld [vmem:[#allocation4 + $0x148] ss:$16 sps:$4 sm:$0xff]  }
 0x137   :  { %v187_v5 = vpop.f32.mrb[0].mxu1 }
 0x138   :  { %v2811_v6 = vadd.f32 %v1999_v4, %v187_v5  ;;  %v2213_v7 = vpop.f32.mrb[1].mxu1  ;;  %v2292_v5 = vld [vmem:[#allocation4 + $0x20] ss:$16 sps:$4 sm:$0xff]  }
 0x139   :  { %v190_v8 = vpop.f32.mrb[2].mxu1  ;;  %v2297_v7 = vld [vmem:[#allocation4 + $0x4c] ss:$16 sps:$4 sm:$0xff]   ;;  %881 = vmatpush1.bf16.msra.mxu0 %v2292_v5  ;;  %v2352_v5 = vld [vmem:[#allocation4 + $0x160] ss:$16 sps:$4 sm:$0xff]  }
 0x13a   :  { %v2813_v9 = vadd.f32 %v1999_v4, %v190_v8  ;;  %194 = vadd.xlane.f32.xlu0 %v2811_v6  ;;  %v2214_v10 = vpop.f32.mrb[3].mxu1  ;;  %v201_v11 = vmul.f32 %v2811_v6, %v2811_v6  ;;  %v2289_v4 = vld [vmem:[#allocation4 + $0x28] ss:$16 sps:$4 sm:$0xff]  }
 0x13b   :  { %v2295_v8 = vld [vmem:[#allocation4 + $0x48] ss:$16 sps:$4 sm:$0xff]   ;;  %v2299_v10 = vld [vmem:[#allocation4 + $0x64] ss:$16 sps:$4 sm:$0xff]  }
 0x13c   :  { %203 = vadd.xlane.f32.xlu1 %v201_v11  ;;  %v202_v12 = vmul.f32 %v2813_v9, %v2813_v9  ;;  %v2303_v11 = vld [vmem:[#allocation4 + $0x6c] ss:$16 sps:$4 sm:$0xff]  }
 0x13e   :  { %196 = vadd.xlane.f32.xlu0 %v2813_v9 }
 0x140   :  { %205 = vadd.xlane.f32.xlu1 %v202_v12  ;;  %v2301_v12 = vld [vmem:[#allocation4 + $0x68] ss:$16 sps:$4 sm:$0xff]  }
 0x1c7   :  { %v195_v30 = vpop.xlane.xlu0 %194 }
 0x1c8   :  { %v199_v31 = vmul.f32 0.0078125, %v195_v30  ;;  %v2838_v30 = vsub.s32 1, %v2829_v27 }
 0x1c9   :  { %v204_v32 = vpop.xlane.xlu1 %203 }
 0x1ca   :  { %v209_v33 = vmul.f32 %v199_v31, %v199_v31  ;;  %v207_v34 = vmul.f32 0.0078125, %v204_v32  ;;  %v215_v46 = vsub.f32 %v2811_v6, %v199_v31  ;;  %v2293_v6 = vld [vmem:[#allocation4 + $0x44] ss:$16 sps:$4 sm:$0xff]   ;;  %v265_v31 = vrot.slane %v260_v29, %v2832_v28 }
 0x1cb   :  { %v197_v35 = vpop.xlane.xlu0 %196  ;;  %882 = vmatprep.subr.bf16.mxu0 %v2293_v6  ;;  %v269_v32 = vrot.slane %v260_v29, %v2838_v30  ;;  %v2353_v6 = vld [vmem:[#allocation4 + $0x184] ss:$16 sps:$4 sm:$0xff]  }
 0x1cc   :  { %v211_v36 = vsub.f32 %v207_v34, %v209_v33  ;;  %v200_v37 = vmul.f32 0.0078125, %v197_v35 }
 0x1cd   :  { %v206_v38 = vpop.xlane.xlu1 %205 }
 0x1ce   :  { %v213_v39 = vmax.f32 %v211_v36, 0.0  ;;  %v210_v40 = vmul.f32 %v200_v37, %v200_v37  ;;  %v208_v41 = vmul.f32 0.0078125, %v206_v38  ;;  %v216_v50 = vsub.f32 %v2813_v9, %v200_v37  ;;  %v2298_v9 = vld [vmem:[#allocation4 + $0x40] ss:$16 sps:$4 sm:$0xff]  }
 0x1cf   :  { %883 = vmatpush1.bf16.msra.mxu0 %v2298_v9  ;;  %v2358_v9 = vld [vmem:[#allocation4 + $0x180] ss:$16 sps:$4 sm:$0xff]  }
 0x1d0   :  { %v217_v42 = vadd.f32 1e-05, %v213_v39  ;;  %v212_v43 = vsub.f32 %v208_v41, %v210_v40  ;;  %884 = vmatprep.subr.bf16.mxu0 %v2299_v10  ;;  %v2359_v10 = vld [vmem:[#allocation4 + $0x1a4] ss:$16 sps:$4 sm:$0xff]  }
 0x1d2   :  { %2497 = vrsqrt.f32 %v217_v42  ;;  %v214_v44 = vmax.f32 %v212_v43, 0.0 }
 0x1d3   :  { %885 = vmatpush1.bf16.msra.mxu0 %v2304_v13  ;;  %v2364_v13 = vld [vmem:[#allocation4 + $0x1a0] ss:$16 sps:$4 sm:$0xff]  }
 0x1d4   :  { %v218_v45 = vadd.f32 1e-05, %v214_v44  ;;  %886 = vmatprep.subr.bf16.mxu0 %v2305_v14  ;;  %v2365_v14 = vld [vmem:[#allocation4 + $0x1c4] ss:$16 sps:$4 sm:$0xff]  }
 0x1d6   :  { %2499 = vrsqrt.f32 %v218_v45 }
 0x1d7   :  { %887 = vmatpush1.bf16.msra.mxu0 %v2310_v17  ;;  %v2370_v17 = vld [vmem:[#allocation4 + $0x1c0] ss:$16 sps:$4 sm:$0xff]  }
 0x1d8   :  { %888 = vmatprep.subr.bf16.mxu0 %v2311_v18  ;;  %v2371_v18 = vld [vmem:[#allocation4 + $0x1e4] ss:$16 sps:$4 sm:$0xff]  }
 0x1db   :  { %889 = vmatpush1.bf16.msra.mxu0 %v2316_v21  ;;  %v2376_v21 = vld [vmem:[#allocation4 + $0x1e0] ss:$16 sps:$4 sm:$0xff]  }
 0x1dc   :  { %v2498_v47 = vpop.eup %2497  ;;  %890 = vmatprep.subr.bf16.mxu0 %v2317_v22 }
 0x1dd   :  { %v221_v49 = vmul.f32 %v2498_v47, %v215_v46 }
 0x1df   :  { %v230_v51 = vmul.f32 %v2002_v48, %v221_v49  ;;  %891 = vmatpush1.bf16.msra.mxu0 %v2322_v25  ;;  %v2323_v49 = vld [vmem:[#allocation4 + $0xe4] ss:$16 sps:$4 sm:$0xff]  }
 0x1e0   :  { %v2500_v52 = vpop.eup %2499  ;;  %892 = vmatprep.subr.bf16.mxu0 %v2323_v49 }
 0x1e1   :  { %v222_v54 = vmul.f32 %v2500_v52, %v216_v50  ;;  %v239_v56 = vadd.f32 %v2003_v53, %v230_v51  ;;  %v2327_v50 = vld [vmem:[#allocation4 + $0xec] ss:$16 sps:$4 sm:$0xff]   ;;  %v2325_v51 = vld [vmem:[#allocation4 + $0xe8] ss:$16 sps:$4 sm:$0xff]   ;;  %v2328_v52 = vld [vmem:[#allocation4 + $0xe0] ss:$16 sps:$4 sm:$0xff]  }
 0x1e3   :  { %v231_v55 = vmul.f32 %v2002_v48, %v222_v54  ;;  %v241_v58 = vmax.f32 %v239_v56, 0.0  ;;  %893 = vmatpush1.bf16.msra.mxu0 %v2328_v52  ;;  %v2333_v54 = vld [vmem:[#allocation4 + $0x10c] ss:$16 sps:$4 sm:$0xff]   ;;  %v2334_v56 = vld [vmem:[#allocation4 + $0x100] ss:$16 sps:$4 sm:$0xff]  }
 0x1e5   :  { %v240_v57 = vadd.f32 %v2003_v53, %v231_v55  ;;  %v2329_v53 = vld [vmem:[#allocation4 + $0x104] ss:$16 sps:$4 sm:$0xff]   ;;  %v2331_v55 = vld [vmem:[#allocation4 + $0x108] ss:$16 sps:$4 sm:$0xff]  }
 0x1e6   :  { %894 = vmatprep.subr.bf16.mxu0 %v2329_v53 }
 0x1e7   :  { %v242_v59 = vmax.f32 %v240_v57, 0.0  ;;  %895 = vmatpush1.bf16.msra.mxu0 %v2334_v56  ;;  %v2335_v57 = vld [vmem:[#allocation4 + $0x124] ss:$16 sps:$4 sm:$0xff]  }
 0x1e8   :  { %896 = vmatprep.subr.bf16.mxu0 %v2335_v57 }
 0x1e9   :  { %v243_v60 = vpack.c.bf16 %v242_v59, %v241_v58  ;;  %v2339_v58 = vld [vmem:[#allocation4 + $0x12c] ss:$16 sps:$4 sm:$0xff]   ;;  %v2337_v59 = vld [vmem:[#allocation4 + $0x128] ss:$16 sps:$4 sm:$0xff]  }
 0x1eb   :  { %385 = vmatmul.mubr.bf16.vlgmr.msra.gmra.mrb[4].mxu1 %v243_v60  ;;  %v2340_v60 = vld [vmem:[#allocation4 + $0x120] ss:$16 sps:$4 sm:$0xff]  }
 0x1ec   :  { %922 = vmatpush1.bf16.msra.mxu1 %v2283_v62  ;;  %897 = vmatpush1.bf16.msra.mxu0 %v2340_v60  ;;  %v2345_v62 = vld [vmem:[#allocation4 + $0x14c] ss:$16 sps:$4 sm:$0xff]  }
 0x1ed   :  { %923 = vmatprep.subr.bf16.mxu1 %v2291_v3  ;;  %898 = vmatprep.subr.bf16.mxu0 %v2341_v61  ;;  %v2349_v3 = vld [vmem:[#allocation4 + $0x168] ss:$16 sps:$4 sm:$0xff]  }
 0x1f0   :  { %924 = vmatpush1.bf16.msra.mxu1 %v2289_v4  ;;  %899 = vmatpush1.bf16.msra.mxu0 %v2346_v1  ;;  %v2351_v4 = vld [vmem:[#allocation4 + $0x16c] ss:$16 sps:$4 sm:$0xff]  }
 0x1f1   :  { %925 = vmatprep.subr.bf16.mxu1 %v2297_v7  ;;  %900 = vmatprep.subr.bf16.mxu0 %v2347_v2  ;;  %v2357_v7 = vld [vmem:[#allocation4 + $0x18c] ss:$16 sps:$4 sm:$0xff]  }
 0x1f4   :  { %926 = vmatpush1.bf16.msra.mxu1 %v2295_v8  ;;  %901 = vmatpush1.bf16.msra.mxu0 %v2352_v5  ;;  %v2355_v8 = vld [vmem:[#allocation4 + $0x188] ss:$16 sps:$4 sm:$0xff]  }
 0x1f5   :  { %927 = vmatprep.subr.bf16.mxu1 %v2303_v11  ;;  %902 = vmatprep.subr.bf16.mxu0 %v2353_v6  ;;  %v2363_v11 = vld [vmem:[#allocation4 + $0x1ac] ss:$16 sps:$4 sm:$0xff]  }
 0x1f8   :  { %928 = vmatpush1.bf16.msra.mxu1 %v2301_v12  ;;  %903 = vmatpush1.bf16.msra.mxu0 %v2358_v9  ;;  %v2361_v12 = vld [vmem:[#allocation4 + $0x1a8] ss:$16 sps:$4 sm:$0xff]   ;;  %v2379_v9 = vld [vmem:[#allocation6 + $0x4] ss:$8 sps:$4 sm:$0xff]  }
 0x1f9   :  { %929 = vmatprep.subr.bf16.mxu1 %v2309_v15  ;;  %904 = vmatprep.subr.bf16.mxu0 %v2359_v10  ;;  %v2369_v15 = vld [vmem:[#allocation4 + $0x1cc] ss:$16 sps:$4 sm:$0xff]  }
 0x1fa   :  { %v2382_v10 = vld [vmem:[#allocation6 + $0x14] ss:$8 sps:$4 sm:$0xff]  }
 0x1fc   :  { %930 = vmatpush1.bf16.msra.mxu1 %v2307_v16  ;;  %905 = vmatpush1.bf16.msra.mxu0 %v2364_v13  ;;  %v2367_v16 = vld [vmem:[#allocation4 + $0x1c8] ss:$16 sps:$4 sm:$0xff]  }
 0x1fd   :  { %931 = vmatprep.subr.bf16.mxu1 %v2315_v19  ;;  %906 = vmatprep.subr.bf16.mxu0 %v2365_v14  ;;  %v2375_v19 = vld [vmem:[#allocation4 + $0x1ec] ss:$16 sps:$4 sm:$0xff]   ;;  %v2383_v13 = vld [vmem:[#allocation6 + $0x20] ss:$8 sps:$4 sm:$0xff]  }
 0x1fe   :  { %v2388_v14 = vld [vmem:[#allocation6 + $0x34] ss:$8 sps:$4 sm:$0xff]  }
 0x200   :  { %932 = vmatpush1.bf16.msra.mxu1 %v2313_v20  ;;  %907 = vmatpush1.bf16.msra.mxu0 %v2370_v17  ;;  %v2373_v20 = vld [vmem:[#allocation4 + $0x1e8] ss:$16 sps:$4 sm:$0xff]  }
 0x201   :  { %933 = vmatprep.subr.bf16.mxu1 %v2321_v23  ;;  %908 = vmatprep.subr.bf16.mxu0 %v2371_v18  ;;  %v2389_v17 = vld [vmem:[#allocation6 + $0x40] ss:$8 sps:$4 sm:$0xff]   ;;  %v2394_v18 = vld [vmem:[#allocation6 + $0x54] ss:$8 sps:$4 sm:$0xff]  }
 0x204   :  { %934 = vmatpush1.bf16.msra.mxu1 %v2319_v24  ;;  %909 = vmatpush1.bf16.msra.mxu0 %v2376_v21  ;;  %v2395_v21 = vld [vmem:[#allocation6 + $0x60] ss:$8 sps:$4 sm:$0xff]  }
 0x205   :  { %935 = vmatprep.subr.bf16.mxu1 %v2327_v50  ;;  %1491 = vmatprep.subr.bf16.mxu0 %v2379_v9  ;;  %v2404_v9 = vld [vmem:[#allocation6 + $0x90] ss:$8 sps:$4 sm:$0xff]  }
 0x208   :  { %936 = vmatpush1.bf16.msra.mxu1 %v2325_v51 }
 0x209   :  { %937 = vmatprep.subr.bf16.mxu1 %v2333_v54 }
 0x20c   :  { %938 = vmatpush1.bf16.msra.mxu1 %v2331_v55 }
 0x20d   :  { %939 = vmatprep.subr.bf16.mxu1 %v2339_v58 }
 0x210   :  { %940 = vmatpush1.bf16.msra.mxu1 %v2337_v59 }
 0x211   :  { %941 = vmatprep.subr.bf16.mxu1 %v2345_v62 }
 0x214   :  { %942 = vmatpush1.bf16.msra.mxu1 %v2343_v63 }
 0x215   :  { %943 = vmatprep.subr.bf16.mxu1 %v2351_v4 }
 0x218   :  { %944 = vmatpush1.bf16.msra.mxu1 %v2349_v3 }
 0x219   :  { %945 = vmatprep.subr.bf16.mxu1 %v2357_v7 }
 0x21c   :  { %946 = vmatpush1.bf16.msra.mxu1 %v2355_v8 }
 0x21d   :  { %947 = vmatprep.subr.bf16.mxu1 %v2363_v11  ;;  %v2380_v11 = vld [vmem:[#allocation6 + $0x10] ss:$8 sps:$4 sm:$0xff]  }
 0x220   :  { %948 = vmatpush1.bf16.msra.mxu1 %v2361_v12  ;;  %v2385_v12 = vld [vmem:[#allocation6 + $0x24] ss:$8 sps:$4 sm:$0xff]  }
 0x221   :  { %949 = vmatprep.subr.bf16.mxu1 %v2369_v15  ;;  %v2386_v15 = vld [vmem:[#allocation6 + $0x30] ss:$8 sps:$4 sm:$0xff]  }
 0x224   :  { %950 = vmatpush1.bf16.msra.mxu1 %v2367_v16  ;;  %v2391_v16 = vld [vmem:[#allocation6 + $0x44] ss:$8 sps:$4 sm:$0xff]  }
 0x225   :  { %951 = vmatprep.subr.bf16.mxu1 %v2375_v19  ;;  %v2392_v19 = vld [vmem:[#allocation6 + $0x50] ss:$8 sps:$4 sm:$0xff]  }
 0x228   :  { %952 = vmatpush1.bf16.msra.mxu1 %v2373_v20  ;;  %v2397_v20 = vld [vmem:[#allocation6 + $0x64] ss:$8 sps:$4 sm:$0xff]  }
 0x2be   :  { %v386_v33 = vpop.f32.mrb[4].mxu1 }
 0x2bf   :  { %v2842_v34 = vadd.f32 %v386_v33, %v265_v31  ;;  %v388_v35 = vpop.f32.mrb[5].mxu1 }
 0x2c0   :  { %v2844_v36 = vadd.f32 %v388_v35, %v269_v32  ;;  %v390_v37 = vpop.f32.mrb[6].mxu1 }
 0x2c1   :  { %v2846_v38 = vadd.f32 %v390_v37, %v265_v31  ;;  %v392_v39 = vpop.f32.mrb[7].mxu1  ;;  %v404_v42 = vmul.f32 %v2842_v34, %v2842_v34 }
 0x2c2   :  { %v2848_v40 = vadd.f32 %v392_v39, %v269_v32  ;;  %v395_v41 = vadd.f32 %v2844_v36, %v2842_v34  ;;  %v405_v43 = vmul.f32 %v2844_v36, %v2844_v36 }
 0x2c3   :  { %v406_v45 = vmul.f32 %v2846_v38, %v2846_v38 }
 0x2c4   :  { %396 = vadd.xlane.f32.xlu0 %v395_v41  ;;  %v398_v44 = vadd.f32 %v2848_v40, %v2846_v38  ;;  %v407_v46 = vmul.f32 %v2848_v40, %v2848_v40  ;;  %v408_v47 = vadd.f32 %v405_v43, %v404_v42 }
 0x2c6   :  { %399 = vadd.xlane.f32.xlu1 %v398_v44  ;;  %v411_v48 = vadd.f32 %v407_v46, %v406_v45  ;;  %v434_v45 = vld [vmem:[%s3087_s27] sm:$0x3] }
 0x2c7   :  { %v450_v46 = vld [vmem:[%s3053_s8] sm:$0x3]  ;;  %v439_v49 = vrot.slane %v434_v45, %v2832_v28  ;;  %v443_v50 = vrot.slane %v434_v45, %v2838_v30 }
 0x2c8   :  { %409 = vadd.xlane.f32.xlu0 %v408_v47  ;;  %v455_v52 = vrot.slane %v450_v46, %v2832_v28  ;;  %v459_v53 = vrot.slane %v450_v46, %v2838_v30 }
 0x2ca   :  { %412 = vadd.xlane.f32.xlu1 %v411_v48 }
 0x351   :  { %v397_v22 = vpop.xlane.xlu0 %396 }
 0x352   :  { %v402_v23 = vmul.f32 0.00390625, %v397_v22  ;;  %v2400_v22 = vld [vmem:[#allocation6 + $0x74] ss:$8 sps:$4 sm:$0xff]  }
 0x353   :  { %v400_v24 = vpop.xlane.xlu1 %399 }
 0x354   :  { %v403_v25 = vmul.f32 0.00390625, %v400_v24  ;;  %v416_v29 = vmul.f32 %v402_v23, %v402_v23  ;;  %v422_v47 = vsub.f32 %v2842_v34, %v402_v23  ;;  %v423_v48 = vsub.f32 %v2844_v36, %v402_v23  ;;  %v2398_v23 = vld [vmem:[#allocation6 + $0x70] ss:$8 sps:$4 sm:$0xff]  }
 0x355   :  { %v410_v26 = vpop.xlane.xlu0 %409  ;;  %v2877_v24 = vsub.s32 2, %v2829_v27 }
 0x356   :  { %v414_v31 = vmul.f32 0.00390625, %v410_v26  ;;  %v417_v35 = vmul.f32 %v403_v25, %v403_v25  ;;  %v424_v54 = vsub.f32 %v2846_v38, %v403_v25  ;;  %v425_v55 = vsub.f32 %v2848_v40, %v403_v25  ;;  %v2377_v40 = vld [vmem:[#allocation6] ss:$8 sps:$4 sm:$0xff]  }
 0x357   :  { %v413_v32 = vpop.xlane.xlu1 %412  ;;  %v536_v25 = vld [vmem:[%s3055_s10] sm:$0xf] }
 0x358   :  { %v418_v33 = vsub.f32 %v414_v31, %v416_v29  ;;  %v415_v37 = vmul.f32 0.00390625, %v413_v32  ;;  %v541_v26 = vrot.slane %v536_v25, %v2832_v28  ;;  %v549_v29 = vrot.slane %v536_v25, %v2877_v24 }
 0x359   :  { %v2885_v31 = vsub.s32 3, %v2829_v27  ;;  %v545_v32 = vrot.slane %v536_v25, %v2838_v30 }
 0x35a   :  { %v420_v39 = vmax.f32 %v418_v33, 0.0  ;;  %v419_v41 = vsub.f32 %v415_v37, %v417_v35 }
 0x35c   :  { %v426_v42 = vadd.f32 1e-05, %v420_v39  ;;  %v421_v43 = vmax.f32 %v419_v41, 0.0 }
 0x35e   :  { %2501 = vrsqrt.f32 %v426_v42  ;;  %v427_v44 = vadd.f32 1e-05, %v421_v43  ;;  %v553_v42 = vrot.slane %v536_v25, %v2885_v31 }
 0x360   :  { %2503 = vrsqrt.f32 %v427_v44 }
 0x368   :  { %v2502_v51 = vpop.eup %2501 }
 0x369   :  { %v431_v56 = vmul.f32 %v2502_v51, %v423_v48  ;;  %v430_v57 = vmul.f32 %v2502_v51, %v422_v47 }
 0x36a   :  { %v2504_v58 = vpop.eup %2503 }
 0x36b   :  { %v433_v59 = vmul.f32 %v2504_v58, %v425_v55  ;;  %v447_v34 = vmul.f32 %v443_v50, %v431_v56  ;;  %v432_v60 = vmul.f32 %v2504_v58, %v424_v54  ;;  %v446_v36 = vmul.f32 %v439_v49, %v430_v57 }
 0x36d   :  { %v449_v61 = vmul.f32 %v443_v50, %v433_v59  ;;  %v463_v62 = vadd.f32 %v459_v53, %v447_v34  ;;  %v448_v63 = vmul.f32 %v439_v49, %v432_v60  ;;  %v462_v1 = vadd.f32 %v455_v52, %v446_v36 }
 0x36f   :  { %v465_v2 = vadd.f32 %v459_v53, %v449_v61  ;;  %v464_v3 = vadd.f32 %v455_v52, %v448_v63  ;;  %v467_v4 = vmax.f32 %v463_v62, 0.0  ;;  %v466_v6 = vmax.f32 %v462_v1, 0.0 }
 0x371   :  { %v469_v5 = vmax.f32 %v465_v2, 0.0  ;;  %v468_v7 = vmax.f32 %v464_v3, 0.0 }
 0x373   :  { %v471_v38 = vpack.c.bf16 %v469_v5, %v467_v4  ;;  %v470_v8 = vpack.c.bf16 %v468_v7, %v466_v6 }
 0x375   :  { %910 = vmatprep.mubr.bf16.mxu0 %v471_v38  ;;  %953 = vmatprep.mubr.bf16.mxu1 %v471_v38  ;;  %v2403_v38 = vld [vmem:[#allocation6 + $0x84] ss:$8 sps:$4 sm:$0xff]  }
 0x376   :  { %911 = vmatmul.mubr.bf16.vlgmr.msra.gmra.mrb[0].mxu0 %v470_v8  ;;  %954 = vmatmul.mubr.bf16.vlgmr.msra.gmra.mrb[8].mxu1 %v470_v8  ;;  %v2401_v8 = vld [vmem:[#allocation6 + $0x80] ss:$8 sps:$4 sm:$0xff]  }
 0x377   :  { %1492 = vmatpush1.bf16.msra.mxu0 %v2377_v40  ;;  %v2406_v40 = vld [vmem:[#allocation6 + $0x94] ss:$8 sps:$4 sm:$0xff]  }
 0x378   :  { %1493 = vmatprep.subr.bf16.mxu0 %v2382_v10  ;;  %v2409_v10 = vld [vmem:[#allocation6 + $0xa4] ss:$8 sps:$4 sm:$0xff]  }
 0x37b   :  { %1494 = vmatpush1.bf16.msra.mxu0 %v2380_v11  ;;  %v2407_v11 = vld [vmem:[#allocation6 + $0xa0] ss:$8 sps:$4 sm:$0xff]  }
 0x37c   :  { %1495 = vmatprep.subr.bf16.mxu0 %v2385_v12  ;;  %v2410_v12 = vld [vmem:[#allocation6 + $0xb0] ss:$8 sps:$4 sm:$0xff]  }
 0x37f   :  { %1496 = vmatpush1.bf16.msra.mxu0 %v2383_v13  ;;  %v2412_v13 = vld [vmem:[#allocation6 + $0xb4] ss:$8 sps:$4 sm:$0xff]  }
 0x380   :  { %1497 = vmatprep.subr.bf16.mxu0 %v2388_v14  ;;  %v2415_v14 = vld [vmem:[#allocation6 + $0xc4] ss:$8 sps:$4 sm:$0xff]  }
 0x383   :  { %1498 = vmatpush1.bf16.msra.mxu0 %v2386_v15  ;;  %v2413_v15 = vld [vmem:[#allocation6 + $0xc0] ss:$8 sps:$4 sm:$0xff]  }
 0x384   :  { %1499 = vmatprep.subr.bf16.mxu0 %v2391_v16  ;;  %v2418_v16 = vld [vmem:[#allocation6 + $0xd4] ss:$8 sps:$4 sm:$0xff]  }
 0x387   :  { %1500 = vmatpush1.bf16.msra.mxu0 %v2389_v17  ;;  %v2416_v17 = vld [vmem:[#allocation6 + $0xd0] ss:$8 sps:$4 sm:$0xff]  }
 0x388   :  { %1501 = vmatprep.subr.bf16.mxu0 %v2394_v18  ;;  %v2421_v18 = vld [vmem:[#allocation6 + $0xe4] ss:$8 sps:$4 sm:$0xff]  }
 0x38b   :  { %1502 = vmatpush1.bf16.msra.mxu0 %v2392_v19  ;;  %v2419_v19 = vld [vmem:[#allocation6 + $0xe0] ss:$8 sps:$4 sm:$0xff]  }
 0x38c   :  { %1503 = vmatprep.subr.bf16.mxu0 %v2397_v20  ;;  %v2424_v20 = vld [vmem:[#allocation6 + $0xf4] ss:$8 sps:$4 sm:$0xff]  }
 0x38f   :  { %1504 = vmatpush1.bf16.msra.mxu0 %v2395_v21  ;;  %v2422_v21 = vld [vmem:[#allocation6 + $0xf0] ss:$8 sps:$4 sm:$0xff]  }
 0x390   :  { %1505 = vmatprep.subr.bf16.mxu0 %v2400_v22  ;;  %v2427_v22 = vld [vmem:[#allocation6 + $0x104] ss:$8 sps:$4 sm:$0xff]  }
 0x393   :  { %1506 = vmatpush1.bf16.msra.mxu0 %v2398_v23 }
 0x394   :  { %1507 = vmatprep.subr.bf16.mxu0 %v2403_v38 }
 0x397   :  { %1508 = vmatpush1.bf16.msra.mxu0 %v2401_v8 }
 0x398   :  { %1509 = vmatprep.subr.bf16.mxu0 %v2406_v40 }
 0x39b   :  { %1510 = vmatpush1.bf16.msra.mxu0 %v2404_v9 }
 0x39c   :  { %1511 = vmatprep.subr.bf16.mxu0 %v2409_v10 }
 0x39f   :  { %1512 = vmatpush1.bf16.msra.mxu0 %v2407_v11 }
 0x3a0   :  { %1513 = vmatprep.subr.bf16.mxu0 %v2412_v13 }
 0x3a3   :  { %1514 = vmatpush1.bf16.msra.mxu0 %v2410_v12 }
 0x3a4   :  { %1515 = vmatprep.subr.bf16.mxu0 %v2415_v14 }
 0x3a7   :  { %1516 = vmatpush1.bf16.msra.mxu0 %v2413_v15 }
 0x3a8   :  { %1517 = vmatprep.subr.bf16.mxu0 %v2418_v16 }
 0x3ab   :  { %1518 = vmatpush1.bf16.msra.mxu0 %v2416_v17 }
 0x3ac   :  { %1519 = vmatprep.subr.bf16.mxu0 %v2421_v18 }
 0x3af   :  { %1520 = vmatpush1.bf16.msra.mxu0 %v2419_v19 }
 0x3b0   :  { %1521 = vmatprep.subr.bf16.mxu0 %v2424_v20 }
 0x3b3   :  { %1522 = vmatpush1.bf16.msra.mxu0 %v2422_v21 }
 0x3b4   :  { %1534 = vmatprep.subr.bf16.mxu0 %v2427_v22 }
 0x449   :  { %v912_v33 = vpop.f32.mrb[0].mxu0  ;;  %v955_v35 = vpop.f32.mrb[8].mxu1 }
 0x44a   :  { %v2888_v37 = vadd.f32 %v912_v33, %v541_v26  ;;  %v2890_v39 = vadd.f32 %v955_v35, %v549_v29  ;;  %v914_v41 = vpop.f32.mrb[1].mxu0  ;;  %v957_v43 = vpop.f32.mrb[9].mxu1 }
 0x44b   :  { %v2893_v44 = vadd.f32 %v914_v41, %v545_v32  ;;  %v916_v45 = vpop.f32.mrb[2].mxu0  ;;  %v959_v46 = vpop.f32.mrb[10].mxu1  ;;  %v2909_v55 = vadd.f32 %v957_v43, %v553_v42 }
 0x44c   :  { %v977_v27 = vmul.f32 %v2888_v37, %v2888_v37  ;;  %v2897_v47 = vadd.f32 %v916_v45, %v541_v26  ;;  %v2899_v48 = vadd.f32 %v959_v46, %v549_v29  ;;  %v918_v49 = vpop.f32.mrb[3].mxu0  ;;  %v961_v50 = vpop.f32.mrb[11].mxu1  ;;  %v979_v54 = vmul.f32 %v2890_v39, %v2890_v39 }
 0x44d   :  { %v964_v51 = vadd.f32 %v2893_v44, %v2888_v37  ;;  %v978_v52 = vmul.f32 %v2893_v44, %v2893_v44  ;;  %v2905_v53 = vadd.f32 %v918_v49, %v545_v32  ;;  %v2920_v36 = vadd.f32 %v961_v50, %v553_v42 }
 0x44e   :  { %v981_v56 = vmul.f32 %v2897_v47, %v2897_v47  ;;  %v983_v60 = vmul.f32 %v2899_v48, %v2899_v48  ;;  %v980_v3 = vmul.f32 %v2909_v55, %v2909_v55 }
 0x44f   :  { %v969_v57 = vadd.f32 %v2905_v53, %v2897_v47  ;;  %v982_v58 = vmul.f32 %v2905_v53, %v2905_v53  ;;  %v965_v59 = vadd.f32 %v964_v51, %v2890_v39  ;;  %v985_v34 = vadd.f32 %v978_v52, %v977_v27  ;;  %v1023_v52 = vld [vmem:[%s3056_s11] sm:$0xf] }
 0x450   :  { %v984_v6 = vmul.f32 %v2920_v36, %v2920_v36 }
 0x451   :  { %v966_v61 = vadd.f32 %v965_v59, %v2909_v55  ;;  %v970_v62 = vadd.f32 %v969_v57, %v2899_v48  ;;  %v986_v63 = vadd.f32 %v985_v34, %v979_v54  ;;  %v990_v1 = vadd.f32 %v982_v58, %v981_v56  ;;  %v1053_v54 = vld [vmem:[%s3057_s12] sm:$0xf] }
 0x452   :  { %v1036_v56 = vrot.slane %v1023_v52, %v2877_v24  ;;  %v1032_v57 = vrot.slane %v1023_v52, %v2838_v30  ;;  %v1028_v58 = vrot.slane %v1023_v52, %v2832_v28  ;;  %v1040_v59 = vrot.slane %v1023_v52, %v2885_v31  ;;  %v2436_v52 = vld [vmem:[#allocation6 + $0x134] ss:$8 sps:$4 sm:$0xff]  }
 0x453   :  { %967 = vadd.xlane.f32.xlu0 %v966_v61  ;;  %v971_v2 = vadd.f32 %v970_v62, %v2920_v36  ;;  %v991_v4 = vadd.f32 %v990_v1, %v983_v60  ;;  %v987_v5 = vadd.f32 %v986_v63, %v980_v3  ;;  %v1062_v3 = vrot.slane %v1053_v54, %v2838_v30 }
 0x454   :  { %v1070_v8 = vrot.slane %v1053_v54, %v2885_v31 }
 0x455   :  { %972 = vadd.xlane.f32.xlu1 %v971_v2  ;;  %v992_v7 = vadd.f32 %v991_v4, %v984_v6  ;;  %v1058_v4 = vrot.slane %v1053_v54, %v2832_v28 }
 0x457   :  { %988 = vadd.xlane.f32.xlu0 %v987_v5 }
 0x459   :  { %993 = vadd.xlane.f32.xlu1 %v992_v7 }
 0x4e0   :  { %v968_v23 = vpop.xlane.xlu0 %967 }
 0x4e1   :  { %v975_v25 = vmul.f32 0.001953125, %v968_v23 }
 0x4e2   :  { %v973_v26 = vpop.xlane.xlu1 %972 }
 0x4e3   :  { %v976_v29 = vmul.f32 0.001953125, %v973_v26  ;;  %v997_v33 = vmul.f32 %v975_v25, %v975_v25  ;;  %v1003_v34 = vsub.f32 %v2888_v37, %v975_v25  ;;  %v1005_v60 = vsub.f32 %v2890_v39, %v975_v25 }
 0x4e4   :  { %v989_v32 = vpop.xlane.xlu0 %988  ;;  %v1004_v61 = vsub.f32 %v2893_v44, %v975_v25  ;;  %v1006_v62 = vsub.f32 %v2909_v55, %v975_v25  ;;  %v1066_v39 = vrot.slane %v1053_v54, %v2877_v24  ;;  %v2434_v54 = vld [vmem:[#allocation6 + $0x130] ss:$8 sps:$4 sm:$0xff]  }
 0x4e5   :  { %v995_v35 = vmul.f32 0.001953125, %v989_v32  ;;  %v998_v43 = vmul.f32 %v976_v29, %v976_v29  ;;  %v1007_v1 = vsub.f32 %v2897_v47, %v976_v29  ;;  %v1008_v2 = vsub.f32 %v2905_v53, %v976_v29 }
 0x4e6   :  { %v994_v41 = vpop.xlane.xlu1 %993  ;;  %v1009_v44 = vsub.f32 %v2899_v48, %v976_v29  ;;  %v1010_v55 = vsub.f32 %v2920_v36, %v976_v29 }
 0x4e7   :  { %v999_v42 = vsub.f32 %v995_v35, %v997_v33  ;;  %v996_v45 = vmul.f32 0.001953125, %v994_v41  ;;  %v2425_v41 = vld [vmem:[#allocation6 + $0x100] ss:$8 sps:$4 sm:$0xff]  }
 0x4e9   :  { %v1001_v46 = vmax.f32 %v999_v42, 0.0  ;;  %v1000_v27 = vsub.f32 %v996_v45, %v998_v43  ;;  %v2430_v45 = vld [vmem:[#allocation6 + $0x114] ss:$8 sps:$4 sm:$0xff]  }
 0x4eb   :  { %v1011_v49 = vadd.f32 1e-05, %v1001_v46  ;;  %v1002_v50 = vmax.f32 %v1000_v27, 0.0 }
 0x4ed   :  { %2505 = vrsqrt.f32 %v1011_v49  ;;  %v1012_v51 = vadd.f32 1e-05, %v1002_v50  ;;  %v2428_v49 = vld [vmem:[#allocation6 + $0x110] ss:$8 sps:$4 sm:$0xff]   ;;  %v2433_v50 = vld [vmem:[#allocation6 + $0x124] ss:$8 sps:$4 sm:$0xff]  }
 0x4ef   :  { %2507 = vrsqrt.f32 %v1012_v51  ;;  %v2431_v51 = vld [vmem:[#allocation6 + $0x120] ss:$8 sps:$4 sm:$0xff]  }
 0x4f7   :  { %v2506_v63 = vpop.eup %2505 }
 0x4f8   :  { %v1016_v5 = vmul.f32 %v2506_v63, %v1004_v61  ;;  %v1015_v6 = vmul.f32 %v2506_v63, %v1003_v34  ;;  %v1018_v7 = vmul.f32 %v2506_v63, %v1006_v62  ;;  %v1017_v38 = vmul.f32 %v2506_v63, %v1005_v60  ;;  %v2445_v34 = vld [vmem:[#allocation6 + $0x164] ss:$8 sps:$4 sm:$0xff]   ;;  %v2443_v60 = vld [vmem:[#allocation6 + $0x160] ss:$8 sps:$4 sm:$0xff]   ;;  %v2448_v61 = vld [vmem:[#allocation6 + $0x174] ss:$8 sps:$4 sm:$0xff]  }
 0x4f9   :  { %v2508_v37 = vpop.eup %2507  ;;  %v2446_v62 = vld [vmem:[#allocation6 + $0x170] ss:$8 sps:$4 sm:$0xff]   ;;  %v2451_v63 = vld [vmem:[#allocation6 + $0x184] ss:$8 sps:$4 sm:$0xff]  }
 0x4fa   :  { %v1020_v47 = vmul.f32 %v2508_v37, %v1008_v2  ;;  %v1046_v40 = vmul.f32 %v1032_v57, %v1016_v5  ;;  %v1019_v53 = vmul.f32 %v2508_v37, %v1007_v1  ;;  %v1045_v9 = vmul.f32 %v1028_v58, %v1015_v6  ;;  %v2449_v1 = vld [vmem:[#allocation6 + $0x180] ss:$8 sps:$4 sm:$0xff]   ;;  %v2454_v2 = vld [vmem:[#allocation6 + $0x194] ss:$8 sps:$4 sm:$0xff]  }
 0x4fb   :  { %v1022_v10 = vmul.f32 %v2508_v37, %v1010_v55  ;;  %v1048_v11 = vmul.f32 %v1040_v59, %v1018_v7  ;;  %v1021_v12 = vmul.f32 %v2508_v37, %v1009_v44  ;;  %v1047_v13 = vmul.f32 %v1036_v56, %v1017_v38  ;;  %v2455_v5 = vld [vmem:[#allocation6 + $0x1a0] ss:$8 sps:$4 sm:$0xff]   ;;  %v2460_v6 = vld [vmem:[#allocation6 + $0x1b4] ss:$8 sps:$4 sm:$0xff]   ;;  %v2458_v7 = vld [vmem:[#allocation6 + $0x1b0] ss:$8 sps:$4 sm:$0xff]  }
 0x4fc   :  { %v1050_v14 = vmul.f32 %v1032_v57, %v1020_v47  ;;  %v1076_v15 = vadd.f32 %v1062_v3, %v1046_v40  ;;  %v1049_v16 = vmul.f32 %v1028_v58, %v1019_v53  ;;  %v1075_v17 = vadd.f32 %v1058_v4, %v1045_v9  ;;  %v2437_v57 = vld [vmem:[#allocation6 + $0x140] ss:$8 sps:$4 sm:$0xff]   ;;  %v2442_v58 = vld [vmem:[#allocation6 + $0x154] ss:$8 sps:$4 sm:$0xff]   ;;  %v2463_v38 = vld [vmem:[#allocation6 + $0x1c4] ss:$8 sps:$4 sm:$0xff]  }
 0x4fd   :  { %v1052_v18 = vmul.f32 %v1040_v59, %v1022_v10  ;;  %v1051_v24 = vmul.f32 %v1036_v56, %v1021_v12  ;;  %v1077_v19 = vadd.f32 %v1066_v39, %v1047_v13  ;;  %v1078_v36 = vadd.f32 %v1070_v8, %v1048_v11  ;;  %v2439_v56 = vld [vmem:[#allocation6 + $0x144] ss:$8 sps:$4 sm:$0xff]   ;;  %v2440_v59 = vld [vmem:[#allocation6 + $0x150] ss:$8 sps:$4 sm:$0xff]   ;;  %v2461_v37 = vld [vmem:[#allocation6 + $0x1c0] ss:$8 sps:$4 sm:$0xff]  }
 0x4fe   :  { %v1080_v48 = vadd.f32 %v1062_v3, %v1050_v14  ;;  %v1079_v20 = vadd.f32 %v1058_v4, %v1049_v16  ;;  %v1084_v22 = vmax.f32 %v1076_v15, 0.0  ;;  %v1083_v25 = vmax.f32 %v1075_v17, 0.0  ;;  %v2452_v3 = vld [vmem:[#allocation6 + $0x190] ss:$8 sps:$4 sm:$0xff]   ;;  %v2457_v4 = vld [vmem:[#allocation6 + $0x1a4] ss:$8 sps:$4 sm:$0xff]  }
 0x4ff   :  { %v1082_v21 = vadd.f32 %v1070_v8, %v1052_v18  ;;  %v1081_v31 = vadd.f32 %v1066_v39, %v1051_v24  ;;  %v1085_v32 = vmax.f32 %v1077_v19, 0.0  ;;  %v1086_v43 = vmax.f32 %v1078_v36, 0.0  ;;  %v2466_v39 = vld [vmem:[#allocation6 + $0x1d4] ss:$8 sps:$4 sm:$0xff]   ;;  %v2464_v44 = vld [vmem:[#allocation6 + $0x1d0] ss:$8 sps:$4 sm:$0xff]  }
 0x500   :  { %v1088_v23 = vmax.f32 %v1080_v48, 0.0  ;;  %v1087_v26 = vmax.f32 %v1079_v20, 0.0  ;;  %v2469_v55 = vld [vmem:[#allocation6 + $0x1e4] ss:$8 sps:$4 sm:$0xff]   ;;  %v2467_v8 = vld [vmem:[#allocation6 + $0x1e0] ss:$8 sps:$4 sm:$0xff]  }
 0x501   :  { %v1090_v29 = vmax.f32 %v1082_v21, 0.0  ;;  %v1089_v33 = vmax.f32 %v1081_v31, 0.0  ;;  %v2472_v47 = vld [vmem:[#allocation6 + $0x1f4] ss:$8 sps:$4 sm:$0xff]   ;;  %v2470_v40 = vld [vmem:[#allocation6 + $0x1f0] ss:$8 sps:$4 sm:$0xff]  }
 0x502   :  { %v1092_v35 = vpack.c.bf16 %v1088_v23, %v1084_v22  ;;  %v1091_v42 = vpack.c.bf16 %v1087_v26, %v1083_v25  ;;  %v1159_v53 = vld [vmem:[%s3059_s14] sm:$0x3]  ;;  %v2475_v26 = vld [vmem:[#allocation7 + $0x48] sm:$0xff]  }
 0x503   :  { %v2951_v46 = vpack.c.bf16 %v1089_v33, %v1085_v32  ;;  %v1094_v27 = vpack.c.bf16 %v1090_v29, %v1086_v43  ;;  %v1164_v9 = vrot.slane %v1159_v53, %v2832_v28  ;;  %v1168_v10 = vrot.slane %v1159_v53, %v2838_v30  ;;  %v2473_v23 = vld [vmem:[#allocation7 + $0x40] sm:$0xff]   ;;  %v2476_v29 = vld [vmem:[#allocation7 + $0x8] sm:$0xff]   ;;  %v2477_v32 = vld [vmem:[#allocation7 + $0x50] sm:$0xff]  }
 0x504   :  { %1523 = vmatprep.mubr.bf16.mxu0 %v1092_v35  ;;  %v2474_v25 = vld [vmem:[#allocation7] sm:$0xff]   ;;  %2178 = vmatprep.subr.bf16.mxu1 %v2473_v23  ;;  %v2478_v33 = vld [vmem:[#allocation7 + $0x10] sm:$0xff]   ;;  %v2479_v35 = vld [vmem:[#allocation7 + $0x58] sm:$0xff]  }
 0x505   :  { %1524 = vmatmul.mubr.bf16.vlgmr.msra.gmra.mrb[4].mxu0 %v1091_v42  ;;  %2179 = vmatpush3.bf16.msra.mxu1 %v2474_v25  ;;  %v2481_v42 = vld [vmem:[#allocation7 + $0x60] sm:$0xff]  }
 0x506   :  { %1535 = vmatpush1.bf16.msra.mxu0 %v2425_v41  ;;  %1566 = vmatprep.mubr.bf16.mxu0 %v1094_v27  ;;  %v2480_v41 = vld [vmem:[#allocation7 + $0x18] sm:$0xff]   ;;  %v2482_v43 = vld [vmem:[#allocation7 + $0x20] sm:$0xff]   ;;  %v2485_v27 = vld [vmem:[#allocation7 + $0x70] sm:$0xff]  }
 0x507   :  { %1536 = vmatprep.subr.bf16.mxu0 %v2430_v45  ;;  %2180 = vmatprep.subr.bf16.mxu1 %v2475_v26  ;;  %v2483_v45 = vld [vmem:[#allocation7 + $0x68] sm:$0xff]   ;;  %v2148_v23 = vld [vmem:[%s3063_s18] ss:$0 sm:$0xff] }
 0x509   :  { %2181 = vmatpush3.bf16.msra.mxu1 %v2476_v29 }
 0x50a   :  { %1537 = vmatpush1.bf16.msra.mxu0 %v2428_v49  ;;  %2182 = vmatprep.subr.bf16.mxu1 %v2477_v32  ;;  %v2486_v49 = vld [vmem:[#allocation7 + $0x30] sm:$0xff]  }
 0x50b   :  { %1538 = vmatprep.subr.bf16.mxu0 %v2433_v50  ;;  %v2487_v50 = vld [vmem:[#allocation7 + $0x78] sm:$0xff]  }
 0x50d   :  { %2183 = vmatpush3.bf16.msra.mxu1 %v2478_v33 }
 0x50e   :  { %1539 = vmatpush1.bf16.msra.mxu0 %v2431_v51  ;;  %2184 = vmatprep.subr.bf16.mxu1 %v2479_v35  ;;  %v2488_v51 = vld [vmem:[#allocation7 + $0x38] sm:$0xff]  }
 0x50f   :  { %1540 = vmatprep.subr.bf16.mxu0 %v2436_v52 }
 0x511   :  { %2185 = vmatpush3.bf16.msra.mxu1 %v2480_v41 }
 0x512   :  { %1541 = vmatpush1.bf16.msra.mxu0 %v2434_v54  ;;  %2186 = vmatprep.subr.bf16.mxu1 %v2481_v42 }
 0x513   :  { %1542 = vmatprep.subr.bf16.mxu0 %v2439_v56 }
 0x515   :  { %2187 = vmatpush3.bf16.msra.mxu1 %v2482_v43 }
 0x516   :  { %1543 = vmatpush1.bf16.msra.mxu0 %v2437_v57  ;;  %2188 = vmatprep.subr.bf16.mxu1 %v2483_v45  ;;  %v2489_v45 = vld [vmem:[%s3066_s21] sm:$0xff]  }
 0x517   :  { %1544 = vmatprep.subr.bf16.mxu0 %v2442_v58 }
 0x51a   :  { %1545 = vmatpush1.bf16.msra.mxu0 %v2440_v59 }
 0x51b   :  { %1546 = vmatprep.subr.bf16.mxu0 %v2445_v34 }
 0x51e   :  { %1547 = vmatpush1.bf16.msra.mxu0 %v2443_v60 }
 0x51f   :  { %1548 = vmatprep.subr.bf16.mxu0 %v2448_v61 }
 0x522   :  { %1549 = vmatpush1.bf16.msra.mxu0 %v2446_v62 }
 0x523   :  { %1550 = vmatprep.subr.bf16.mxu0 %v2451_v63 }
 0x526   :  { %1551 = vmatpush1.bf16.msra.mxu0 %v2449_v1 }
 0x527   :  { %1552 = vmatprep.subr.bf16.mxu0 %v2454_v2 }
 0x52a   :  { %1553 = vmatpush1.bf16.msra.mxu0 %v2452_v3 }
 0x52b   :  { %1554 = vmatprep.subr.bf16.mxu0 %v2457_v4 }
 0x52e   :  { %1555 = vmatpush1.bf16.msra.mxu0 %v2455_v5 }
 0x52f   :  { %1556 = vmatprep.subr.bf16.mxu0 %v2460_v6  ;;  %v1615_v6 = vld [vmem:[%s3060_s15] sm:$0x3] }
 0x532   :  { %1557 = vmatpush1.bf16.msra.mxu0 %v2458_v7  ;;  %v1631_v7 = vld [vmem:[%s3061_s16] sm:$0x3] }
 0x533   :  { %1558 = vmatprep.subr.bf16.mxu0 %v2463_v38 }
 0x536   :  { %1559 = vmatpush1.bf16.msra.mxu0 %v2461_v37 }
 0x537   :  { %1560 = vmatprep.subr.bf16.mxu0 %v2466_v39  ;;  %v1620_v39 = vrot.slane %v1615_v6, %v2832_v28 }
 0x53a   :  { %1561 = vmatpush1.bf16.msra.mxu0 %v2464_v44  ;;  %v1624_v44 = vrot.slane %v1615_v6, %v2838_v30 }
 0x53b   :  { %1562 = vmatprep.subr.bf16.mxu0 %v2469_v55 }
 0x53e   :  { %1563 = vmatpush1.bf16.msra.mxu0 %v2467_v8  ;;  %v1636_v8 = vrot.slane %v1631_v7, %v2832_v28 }
 0x53f   :  { %1564 = vmatprep.subr.bf16.mxu0 %v2472_v47  ;;  %v1640_v47 = vrot.slane %v1631_v7, %v2838_v30 }
 0x542   :  { %1565 = vmatpush1.bf16.msra.mxu0 %v2470_v40 }
 0x545   :  { %1567 = vmatmul.mubr.bf16.vlgmr.msra.gmra.mrb[4].mxu0 %v2951_v46  ;;  %v2484_v46 = vld [vmem:[#allocation7 + $0x28] sm:$0xff]  }
 0x546   :  { %2189 = vmatpush3.bf16.msra.mxu1 %v2484_v46  ;;  %v2490_v46 = vld [vmem:[%s3066_s21 + $0x8] sm:$0xff]  }
 0x547   :  { %2190 = vmatprep.subr.bf16.mxu1 %v2485_v27  ;;  %v2491_v27 = vld [vmem:[%s3066_s21 + $0x10] sm:$0xff]  }
 0x54a   :  { %2191 = vmatpush3.bf16.msra.mxu1 %v2486_v49  ;;  %v2492_v49 = vld [vmem:[%s3066_s21 + $0x18] sm:$0xff]  }
 0x54b   :  { %2192 = vmatprep.subr.bf16.mxu1 %v2487_v50  ;;  %v2493_v50 = vld [vmem:[%s3066_s21 + $0x20] sm:$0xff]  }
 0x54e   :  { %2193 = vmatpush3.bf16.msra.mxu1 %v2488_v51  ;;  %v2494_v51 = vld [vmem:[%s3066_s21 + $0x28] sm:$0xff]  }
 0x54f   :  { %2215 = vmatprep.subr.bf16.mxu1 %v2621_v0 }
 0x618   :  { %v1568_v11 = vpop.f32.mrb[4].mxu0 }
 0x619   :  { %v2959_v12 = vadd.f32 %v1568_v11, %v1164_v9  ;;  %v1570_v13 = vpop.f32.mrb[5].mxu0 }
 0x61a   :  { %v2961_v14 = vadd.f32 %v1570_v13, %v1168_v10  ;;  %v1572_v15 = vpop.f32.mrb[6].mxu0 }
 0x61b   :  { %v2963_v16 = vadd.f32 %v1572_v15, %v1164_v9  ;;  %v1574_v17 = vpop.f32.mrb[7].mxu0  ;;  %v1585_v19 = vmul.f32 %v2959_v12, %v2959_v12 }
 0x61c   :  { %v2965_v18 = vadd.f32 %v1574_v17, %v1168_v10  ;;  %v1577_v24 = vadd.f32 %v2961_v14, %v2959_v12  ;;  %v1586_v48 = vmul.f32 %v2961_v14, %v2961_v14 }
 0x61d   :  { %v1587_v36 = vmul.f32 %v2963_v16, %v2963_v16 }
 0x61e   :  { %1578 = vadd.xlane.f32.xlu0 %v1577_v24  ;;  %v1580_v20 = vadd.f32 %v2965_v18, %v2963_v16  ;;  %v1588_v21 = vmul.f32 %v2965_v18, %v2965_v18  ;;  %v1589_v31 = vadd.f32 %v1586_v48, %v1585_v19 }
 0x620   :  { %1581 = vadd.xlane.f32.xlu1 %v1580_v20  ;;  %v1592_v22 = vadd.f32 %v1588_v21, %v1587_v36 }
 0x622   :  { %1590 = vadd.xlane.f32.xlu0 %v1589_v31 }
 0x624   :  { %1593 = vadd.xlane.f32.xlu1 %v1592_v22 }
 0x6ab   :  { %v1579_v52 = vpop.xlane.xlu0 %1578 }
 0x6ac   :  { %v1583_v54 = vmul.f32 0.00390625, %v1579_v52  ;;  %v2495_v52 = vld [vmem:[%s3066_s21 + $0x30] sm:$0xff]  }
 0x6ad   :  { %v1582_v56 = vpop.xlane.xlu1 %1581 }
 0x6ae   :  { %v1584_v57 = vmul.f32 0.00390625, %v1582_v56  ;;  %v1597_v59 = vmul.f32 %v1583_v54, %v1583_v54  ;;  %v1603_v38 = vsub.f32 %v2959_v12, %v1583_v54  ;;  %v1604_v37 = vsub.f32 %v2961_v14, %v1583_v54  ;;  %v2496_v54 = vld [vmem:[%s3066_s21 + $0x38] sm:$0xff]  }
 0x6af   :  { %v1591_v58 = vpop.xlane.xlu0 %1590 }
 0x6b0   :  { %v1595_v34 = vmul.f32 0.00390625, %v1591_v58  ;;  %v1598_v62 = vmul.f32 %v1584_v57, %v1584_v57  ;;  %v1605_v40 = vsub.f32 %v2963_v16, %v1584_v57  ;;  %v1606_v53 = vsub.f32 %v2965_v18, %v1584_v57 }
 0x6b1   :  { %v1594_v60 = vpop.xlane.xlu1 %1593 }
 0x6b2   :  { %v1599_v61 = vsub.f32 %v1595_v34, %v1597_v59  ;;  %v1596_v63 = vmul.f32 0.00390625, %v1594_v60 }
 0x6b4   :  { %v1601_v1 = vmax.f32 %v1599_v61, 0.0  ;;  %v1600_v2 = vsub.f32 %v1596_v63, %v1598_v62 }
 0x6b6   :  { %v1607_v3 = vadd.f32 1e-05, %v1601_v1  ;;  %v1602_v4 = vmax.f32 %v1600_v2, 0.0 }
 0x6b8   :  { %2509 = vrsqrt.f32 %v1607_v3  ;;  %v1608_v5 = vadd.f32 1e-05, %v1602_v4 }
 0x6ba   :  { %2511 = vrsqrt.f32 %v1608_v5 }
 0x6c2   :  { %v2510_v55 = vpop.eup %2509 }
 0x6c3   :  { %v1612_v9 = vmul.f32 %v2510_v55, %v1604_v37  ;;  %v1611_v10 = vmul.f32 %v2510_v55, %v1603_v38  ;;  %v2165_v37 = vld [vmem:[%s3064_s19] ss:$0 sm:$0xff] }
 0x6c4   :  { %v2512_v11 = vpop.eup %2511 }
 0x6c5   :  { %v1614_v13 = vmul.f32 %v2512_v11, %v1606_v53  ;;  %v1628_v12 = vmul.f32 %v1624_v44, %v1612_v9  ;;  %v1613_v15 = vmul.f32 %v2512_v11, %v1605_v40  ;;  %v1627_v14 = vmul.f32 %v1620_v39, %v1611_v10 }
 0x6c7   :  { %v1630_v17 = vmul.f32 %v1624_v44, %v1614_v13  ;;  %v1644_v24 = vadd.f32 %v1640_v47, %v1628_v12  ;;  %v1629_v19 = vmul.f32 %v1620_v39, %v1613_v15  ;;  %v1643_v48 = vadd.f32 %v1636_v8, %v1627_v14  ;;  %v2167_v15 = vld [vmem:[%s3067_s22] ss:$0 sm:$0xff] }
 0x6c9   :  { %v1646_v20 = vadd.f32 %v1640_v47, %v1630_v17  ;;  %v1645_v36 = vadd.f32 %v1636_v8, %v1629_v19  ;;  %v1648_v28 = vmax.f32 %v1644_v24, 0.0  ;;  %v1647_v30 = vmax.f32 %v1643_v48, 0.0  ;;  %v2166_v8 = vld [vmem:[%s3065_s20] ss:$0 sm:$0xff]  ;;  %s3088_s20 = sld [smem:[#allocation20_spill]] }
 0x6cb   :  { %v1650_v21 = vmax.f32 %v1646_v20, 0.0  ;;  %v1649_v31 = vmax.f32 %v1645_v36, 0.0 }
 0x6cd   :  { %v1652_v16 = vpack.c.bf16 %v1650_v21, %v1648_v28  ;;  %v1651_v22 = vpack.c.bf16 %v1649_v31, %v1647_v30 }
 0x6cf   :  { %1820 = vmatprep.mubr.bf16.mxu1 %v1652_v16 }
 0x6d0   :  { %1821 = vmatmul.mubr.bf16.vlgmr.msra.gmra.mrb[12].mxu1 %v1651_v22 }
 0x6d1   :  { %2231 = vmatprep.mubr.msk.bf16.mxu1 %vm2622_vm0, %v2621_v0  ;;  %2216 = vmatpush3.bf16.msra.mxu1 %v2489_v45 }
 0x6d2   :  { %2217 = vmatprep.subr.bf16.mxu1 %v2621_v0 }
 0x6d5   :  { %2218 = vmatpush3.bf16.msra.mxu1 %v2490_v46 }
 0x6d6   :  { %2219 = vmatprep.subr.bf16.mxu1 %v2621_v0 }
 0x6d9   :  { %2220 = vmatpush3.bf16.msra.mxu1 %v2491_v27 }
 0x6da   :  { %2221 = vmatprep.subr.bf16.mxu1 %v2621_v0 }
 0x6dd   :  { %2222 = vmatpush3.bf16.msra.mxu1 %v2492_v49 }
 0x6de   :  { %2223 = vmatprep.subr.bf16.mxu1 %v2621_v0 }
 0x6e1   :  { %2224 = vmatpush3.bf16.msra.mxu1 %v2493_v50 }
 0x6e2   :  { %2225 = vmatprep.subr.bf16.mxu1 %v2621_v0 }
 0x6e5   :  { %2226 = vmatpush3.bf16.msra.mxu1 %v2494_v51 }
 0x6e6   :  { %2227 = vmatprep.subr.bf16.mxu1 %v2621_v0 }
 0x6e9   :  { %2228 = vmatpush3.bf16.msra.mxu1 %v2495_v52 }
 0x6ea   :  { %2229 = vmatprep.subr.bf16.mxu1 %v2621_v0 }
 0x6ed   :  { %2230 = vmatpush3.bf16.msra.mxu1 %v2496_v54 }
 0x7a3   :  { %v2194_v18 = vpop.f32.mrb[12].mxu1 }
 0x7a4   :  { %v2195_v25 = vpop.f32.mrb[13].mxu1 }
 0x7a5   :  { %v2196_v26 = vadd.f32 %v2195_v25, %v2194_v18  ;;  %v2197_v29 = vpop.f32.mrb[14].mxu1 }
 0x7a6   :  { %v2198_v32 = vpop.f32.mrb[15].mxu1 }
 0x7a7   :  { %v1823_v33 = vadd.f32 %v2196_v26, %v2148_v23  ;;  %v2199_v35 = vadd.f32 %v2198_v32, %v2197_v29 }
 0x7a9   :  { %v1826_v41 = vadd.f32 %v2199_v35, %v2148_v23  ;;  %1829 = vadd.xlane.f32.xlu0 %v1823_v33  ;;  %v1835_v42 = vmul.f32 %v1823_v33, %v1823_v33 }
 0x7ab   :  { %1831 = vadd.xlane.f32.xlu1 %v1826_v41  ;;  %v1836_v43 = vmul.f32 %v1826_v41, %v1826_v41 }
 0x7ad   :  { %1837 = vadd.xlane.f32.xlu0 %v1835_v42 }
 0x7af   :  { %1839 = vadd.xlane.f32.xlu1 %v1836_v43 }
 0x836   :  { %v1830_v56 = vpop.xlane.xlu0 %1829 }
 0x837   :  { %v1833_v57 = vmul.f32 0.0078125, %v1830_v56 }
 0x838   :  { %v1832_v58 = vpop.xlane.xlu1 %1831 }
 0x839   :  { %v1834_v59 = vmul.f32 0.0078125, %v1832_v58  ;;  %v1843_v60 = vmul.f32 %v1833_v57, %v1833_v57  ;;  %v1849_v0 = vsub.f32 %v1823_v33, %v1833_v57 }
 0x83a   :  { %v1838_v34 = vpop.xlane.xlu0 %1837 }
 0x83b   :  { %v1841_v61 = vmul.f32 0.0078125, %v1838_v34  ;;  %v1844_v63 = vmul.f32 %v1834_v59, %v1834_v59  ;;  %v1850_v39 = vsub.f32 %v1826_v41, %v1834_v59 }
 0x83c   :  { %v1840_v62 = vpop.xlane.xlu1 %1839 }
 0x83d   :  { %v1845_v1 = vsub.f32 %v1841_v61, %v1843_v60  ;;  %v1842_v2 = vmul.f32 0.0078125, %v1840_v62 }
 0x83f   :  { %v1847_v3 = vmax.f32 %v1845_v1, 0.0  ;;  %v1846_v4 = vsub.f32 %v1842_v2, %v1844_v63 }
 0x841   :  { %v1851_v5 = vadd.f32 1e-05, %v1847_v3  ;;  %v1848_v6 = vmax.f32 %v1846_v4, 0.0 }
 0x843   :  { %2513 = vrsqrt.f32 %v1851_v5  ;;  %v1852_v7 = vadd.f32 1e-05, %v1848_v6 }
 0x845   :  { %2515 = vrsqrt.f32 %v1852_v7 }
 0x84d   :  { %v2514_v38 = vpop.eup %2513 }
 0x84e   :  { %v1855_v44 = vmul.f32 %v2514_v38, %v1849_v0 }
 0x84f   :  { %v2516_v55 = vpop.eup %2515 }
 0x850   :  { %v1856_v47 = vmul.f32 %v2516_v55, %v1850_v39  ;;  %v1864_v40 = vmul.f32 %v2165_v37, %v1855_v44 }
 0x852   :  { %v1865_v53 = vmul.f32 %v2165_v37, %v1856_v47  ;;  %v1873_v9 = vadd.f32 %v2166_v8, %v1864_v40 }
 0x854   :  { %v1874_v10 = vadd.f32 %v2166_v8, %v1865_v53  ;;  %v1875_v11 = vmax.f32 %v1873_v9, 0.0 }
 0x856   :  { %v1876_v13 = vmax.f32 %v1874_v10, 0.0 }
 0x858   :  { %v1877_v12 = vpack.c.bf16 %v1876_v13, %v1875_v11 }
 0x85a   :  { %2232 = vmatmul.mubr.bf16.vlgmr.msra.gmra.mrb[16].mxu1 %v1877_v12 }
 0x92d   :  { %v1983_v14 = vpop.f32.mrb[16].mxu1 }
 0x92e   :  { %v1984_v17 = vadd.f32 %v2167_v15, %v1983_v14  ;;  %v2233_v24 = vpop.f32.mrb[17].mxu1 }
 0x92f   :  { %v1986_v19 = vpop.f32.mrb[18].mxu1 }
 0x930   :  { %1990 = vst [vmem:[%s3088_s20] sm:$0xff] %v1984_v17  ;;  %v1987_v48 = vadd.f32 %v2167_v15, %v1986_v19  ;;  %v2234_v20 = vpop.f32.mrb[19].mxu1 }
 0x932   :  { %1991 = vst [vmem:[%s3088_s20 + $0x8] sm:$0xff] %v1987_v48 }
 0x933   :  { %1996 = vsyncpa [#allocation3], 1 }
 0x934   :  { %1997 = vsyncpa [#allocation5], 1 }
 0x935   :  { %1998 = vsyncpa [#allocation8], 1 }

</bundles_post_ra>
